<compile_context>
chip_gen: v5e
topology: v5e:2x2
jax: 0.10.0
libtpu: 0.0.40
codegen_flags: <defaults>
</compile_context>

<pallas_src>
import jax
import jax.numpy as jnp
from jax import lax
from jax.experimental import pallas as pl
from jax.experimental.pallas import tpu as pltpu  # noqa: F401  (no TPU-specific API needed)

# ----------------------- config -----------------------
HIDDEN = 32            # config.hidden_size
HH = HIDDEN // 2       # per-direction LSTM hidden size
BATCH = 2
SEQ = 8                # number of words
INIT_RANGE = 0.02      # config.initializer_range

_HI = lax.Precision.HIGHEST

# Weight-slab row offsets (all 8-aligned sublane offsets, lanes 0:128)
_R_WIH = 0      # (H,   8*HH) = (32, 128)  input->gates, gate-major, dir-interleaved
_R_WHH = 32     # (2HH, 8*HH) = (32, 128)  recurrent, block-structured
_R_WTF = 64     # (HH,  H)    = (16, 32)   word_transform rows for fwd features
_R_WTB = 80     # (HH,  H)    = (16, 32)   word_transform rows for bwd features
_R_WW = 96      # (H,   H)    = (32, 32)   word_word_weight (transposed)
_R_AW = 128     # (H,   H)    = (32, 32)   attn_W
_R_TOT = 160


# ----------------------- fused kernel -----------------------
# Gate lane layout (gate-major, direction-interleaved), G = 8*Hh = 4*H = 128:
#   [ i_f | i_b | f_f | f_b | g_f | g_b | o_f | o_b ]   (each block Hh lanes)
# so every gate slice (width 2*Hh) is already in the [fwd | bwd] order of the merged state.
def fused_kernel(words_ref, sent_ref, maskb_ref, w_ref, b_ref, out_ref):
    B, L, H = words_ref.shape
    Hh = H // 2
    G = 8 * Hh

    # ---- packed-slab weight views (static slices, 2 DMAs total for all params) ----
    wih = w_ref[_R_WIH:_R_WIH + H, :]                # (H, G)
    whh = w_ref[_R_WHH:_R_WHH + 2 * Hh, :]           # (2*Hh, G)
    wt_f = w_ref[_R_WTF:_R_WTF + Hh, 0:H]            # (Hh, H)
    wt_b = w_ref[_R_WTB:_R_WTB + Hh, 0:H]            # (Hh, H)
    ww = w_ref[_R_WW:_R_WW + H, 0:H]                 # (H, H)
    attnW = w_ref[_R_AW:_R_AW + H, 0:H]              # (H, H)
    b_g = b_ref[0:1, :]                              # (1, G)
    bt = b_ref[1:2, 0:H]                             # (1, H)
    bw = b_ref[2:3, 0:H]                             # (1, H)
    wfc1 = b_ref[3:4, 0:H]                           # (1, H)   fc-diff weights (weighted part)
    wfc2 = b_ref[4:5, 0:H]                           # (1, H)   fc-diff weights (sentence part)
    bfc = b_ref[5:6, 0:1]                            # (1, 1)

    # ---- stage 1: hoisted input projection, all timesteps & both directions ----
    gates_in = jnp.einsum('blh,bhg->blg', words_ref[...],
                          jnp.broadcast_to(wih, (B, H, G)),
                          preferred_element_type=jnp.float32,
                          precision=_HI) + b_g                          # (B, L, G)

    # direction select hoisted out of the recurrence (pure trace-time expansion)
    lane = lax.broadcasted_iota(jnp.int32, (B, G), 1)
    fwd_lane = (lane & (2 * Hh - 1)) < Hh
    gx = [jnp.where(fwd_lane, gates_in[:, s, :], gates_in[:, L - 1 - s, :])
          for s in range(L)]

    # ---- stage 2: merged bi-directional recurrence, fully unrolled, vreg-resident ----
    h = jnp.zeros((B, 2 * Hh), jnp.float32)           # [h_f | h_b]
    c = jnp.zeros((B, 2 * Hh), jnp.float32)           # [c_f | c_b]
    hf_list, hb_list = [], []
    for s in range(L):
        gates = gx[s] + jnp.dot(h, whh, preferred_element_type=jnp.float32)
        sg = jax.nn.sigmoid(gates)                    # EUP push 1 (i, f, o)
        tg = jnp.tanh(gates)                          # EUP push 2 (g)
        i_g = sg[:, 0 * Hh:2 * Hh]
        f_g = sg[:, 2 * Hh:4 * Hh]
        g_g = tg[:, 4 * Hh:6 * Hh]
        o_g = sg[:, 6 * Hh:8 * Hh]
        c = f_g * c + i_g * g_g
        h = o_g * jnp.tanh(c)                         # EUP push 3
        hf_list.append(h[:, 0:Hh])
        hb_list.append(h[:, Hh:2 * Hh])

    hf = jnp.stack(hf_list, axis=1)                   # (B, L, Hh) fwd outputs, position order
    hb = jnp.stack(hb_list[::-1], axis=1)             # (B, L, Hh) bwd outputs, position order

    # ---- stage 3: word MLP, split fwd/bwd matmuls (no lane interleave) ----
    h1 = jnp.tanh(
        jnp.einsum('blf,bfh->blh', hf, jnp.broadcast_to(wt_f, (B, Hh, H)),
                   preferred_element_type=jnp.float32)
        + jnp.einsum('blf,bfh->blh', hb, jnp.broadcast_to(wt_b, (B, Hh, H)),
                     preferred_element_type=jnp.float32)
        + bt)                                                           # (B, L, H)
    wo = jnp.einsum('blh,bhk->blk', h1, jnp.broadcast_to(ww, (B, H, H)),
                    preferred_element_type=jnp.float32) + bw            # (B, L, H)

    # ---- stage 4: bilinear attention + masked softmax + weighted sum (VPU/XLU) ----
    sent = sent_ref[...]                                                # (B, H)
    tq = jnp.dot(sent, attnW, preferred_element_type=jnp.float32)       # (B, H)
    logits = jnp.sum(tq[:, None, :] * wo, axis=-1, keepdims=True) \
        + maskb_ref[...]                                                # (B, L, 1)
    logits = logits - jnp.max(logits, axis=1, keepdims=True)
    e = jnp.exp(logits)
    alpha = e / jnp.sum(e, axis=1, keepdims=True)                       # (B, L, 1)
    weighted = jnp.sum(alpha * wo, axis=1, keepdims=True)               # (B, 1, H)

    # ---- stage 5: fc as VPU reduce; binary softmax == sigmoid(logit_1 - logit_0) ----
    d = jnp.sum(weighted * wfc1 + sent[:, None, :] * wfc2,
                axis=-1, keepdims=True) + bfc                           # (B, 1, 1)
    out_ref[...] = jax.nn.sigmoid(d[:, 0, :])                           # (B, 1)


# ----------------------- wrapper -----------------------
def word_attention_feature(sentence, words, words_attention_mask, kp):
    B, L, H = words.shape
    # additive mask bias, pre-shaped (B, L, 1) to match the in-kernel softmax layout
    mask_bias = (1.0 - words_attention_mask.astype(jnp.float32))[:, :, None] * (-10000.0)
    out = pl.pallas_call(
        fused_kernel,
        out_shape=jax.ShapeDtypeStruct((B, 1), jnp.float32),
    )(words, sentence, mask_bias, kp['w_slab'], kp['b_slab'])
    return out[:, 0]


# ------------- one-time parameter preparation (packed, kernel-ready slabs) ----------
def prepare_params(p):
    H, Hh = HIDDEN, HH
    G = 8 * Hh

    # gate-major, direction-interleaved columns: [i_f,i_b,f_f,f_b,g_f,g_b,o_f,o_b]
    wih_blocks, b_blocks = [], []
    for g in range(4):
        wih_blocks.append(p['wih_f'][g * Hh:(g + 1) * Hh, :].T)     # (H, Hh)
        wih_blocks.append(p['wih_b'][g * Hh:(g + 1) * Hh, :].T)
        b_blocks.append(p['b_f'][g * Hh:(g + 1) * Hh])
        b_blocks.append(p['b_b'][g * Hh:(g + 1) * Hh])
    wih_comb = jnp.concatenate(wih_blocks, axis=1)                  # (H, G)
    b_comb = jnp.concatenate(b_blocks)                              # (G,)

    # block-structured recurrent weight: rows 0:Hh = h_fwd -> fwd gate columns,
    # rows Hh:2Hh = h_bwd -> bwd gate columns, zeros elsewhere.
    whh_comb = jnp.zeros((2 * Hh, G), jnp.float32)
    for g in range(4):
        whh_comb = whh_comb.at[:Hh, g * 2 * Hh:g * 2 * Hh + Hh].set(
            p['whh_f'][g * Hh:(g + 1) * Hh, :].T)
        whh_comb = whh_comb.at[Hh:, g * 2 * Hh + Hh:(g + 1) * 2 * Hh].set(
            p['whh_b'][g * Hh:(g + 1) * Hh, :].T)

    wtT = p['wt'].T                                                 # (H, H) rows=[fwd|bwd] features
    wwT = p['ww'].T
    wfc_diff = p['wfc'][1] - p['wfc'][0]                            # (2H,)
    bfc_diff = p['bfc'][1] - p['bfc'][0]

    # weight slab: one DMA, every sub-matrix at an 8-aligned sublane offset
    w_slab = jnp.zeros((_R_TOT, G), jnp.float32)
    w_slab = w_slab.at[_R_WIH:_R_WIH + H, :].set(wih_comb)
    w_slab = w_slab.at[_R_WHH:_R_WHH + 2 * Hh, :].set(whh_comb)
    w_slab = w_slab.at[_R_WTF:_R_WTF + Hh, 0:H].set(wtT[:Hh, :])
    w_slab = w_slab.at[_R_WTB:_R_WTB + Hh, 0:H].set(wtT[Hh:, :])
    w_slab = w_slab.at[_R_WW:_R_WW + H, 0:H].set(wwT)
    w_slab = w_slab.at[_R_AW:_R_AW + H, 0:H].set(p['attn_W'])

    # bias slab: one DMA (one vreg tile)
    b_slab = jnp.zeros((8, G), jnp.float32)
    b_slab = b_slab.at[0, :].set(b_comb)
    b_slab = b_slab.at[1, 0:H].set(p['bt'])
    b_slab = b_slab.at[2, 0:H].set(p['bw'])
    b_slab = b_slab.at[3, 0:H].set(wfc_diff[:H])
    b_slab = b_slab.at[4, 0:H].set(wfc_diff[H:])
    b_slab = b_slab.at[5, 0].set(bfc_diff)

    return dict(w_slab=w_slab, b_slab=b_slab)


# ----------------------- deterministic parameter init -----------------------
def init_params(key):
    H, Hh = HIDDEN, HH
    ks = jax.random.split(key, 12)

    def nrm(k, shape, std):
        return std * jax.random.normal(k, shape, jnp.float32)

    return dict(
        # LSTM (PyTorch layout: weight (4*Hh, in), gate order i,f,g,o; b = b_ih + b_hh)
        wih_f=nrm(ks[0], (4 * Hh, H), 0.1),
        whh_f=nrm(ks[1], (4 * Hh, Hh), 0.1),
        b_f=nrm(ks[2], (4 * Hh,), 0.1),
        wih_b=nrm(ks[3], (4 * Hh, H), 0.1),
        whh_b=nrm(ks[4], (4 * Hh, Hh), 0.1),
        b_b=nrm(ks[5], (4 * Hh,), 0.1),
        # word_transform / word_word_weight (PyTorch Linear: y = x @ W.T + b)
        wt=nrm(ks[6], (H, H), 0.1), bt=nrm(ks[7], (H,), 0.1),
        ww=nrm(ks[8], (H, H), 0.1), bw=nrm(ks[9], (H,), 0.1),
        # attn_W ~ N(0, initializer_range)
        attn_W=nrm(ks[10], (H, H), INIT_RANGE),
        # fc: Linear(2H, 2)
        wfc=nrm(ks[11], (2, 2 * H), 0.1),
        bfc=jnp.zeros((2,), jnp.float32),
    )


# ----------------------- pure-JAX reference -----------------------
def reference(sentence, words, mask, p):
    Hh = HH

    def lstm_dir(x, Wih, Whh, b):
        B = x.shape[0]

        def step(carry, xt):
            h, c = carry
            gates = xt @ Wih.T + h @ Whh.T + b
            i = jax.nn.sigmoid(gates[:, :Hh])
            f = jax.nn.sigmoid(gates[:, Hh:2 * Hh])
            g = jnp.tanh(gates[:, 2 * Hh:3 * Hh])
            o = jax.nn.sigmoid(gates[:, 3 * Hh:])
            c = f * c + i * g
            h = o * jnp.tanh(c)
            return (h, c), h

        init = (jnp.zeros((B, Hh), jnp.float32), jnp.zeros((B, Hh), jnp.float32))
        _, hs = lax.scan(step, init, jnp.swapaxes(x, 0, 1))
        return jnp.swapaxes(hs, 0, 1)

    fwd = lstm_dir(words, p['wih_f'], p['whh_f'], p['b_f'])
    bwd = lstm_dir(words[:, ::-1], p['wih_b'], p['whh_b'], p['b_b'])[:, ::-1]
    lstm_out = jnp.concatenate([fwd, bwd], axis=-1)

    wo = jnp.tanh(lstm_out @ p['wt'].T + p['bt']) @ p['ww'].T + p['bw']
    t = sentence @ p['attn_W']
    logits = jnp.einsum('bh,blh->bl', t, wo) + (1.0 - mask.astype(jnp.float32)) * -10000.0
    alpha = jax.nn.softmax(logits, axis=-1)
    weighted = jnp.einsum('bl,blh->bh', alpha, wo)
    cat = jnp.concatenate([weighted, sentence], axis=-1)
    sim = jax.nn.softmax(cat @ p['wfc'].T + p['bfc'], axis=-1)
    return sim[:, 1]


if __name__ == "__main__":
    key = jax.random.PRNGKey(0)
    kp, k1, k2, k3 = jax.random.split(key, 4)
    params = init_params(kp)
    kparams = prepare_params(params)

    sentence = jax.random.normal(k1, (BATCH, HIDDEN), jnp.float32)
    words = jax.random.normal(k2, (BATCH, SEQ, HIDDEN), jnp.float32)
    mask = (jax.random.uniform(k3, (BATCH, SEQ)) > 0.2).astype(jnp.int32)
    mask = mask.at[:, 0].set(1)   # at least one valid word per example

    fwd_fn = jax.jit(word_attention_feature)
    out = jax.block_until_ready(fwd_fn(sentence, words, mask, kparams))

    with jax.default_matmul_precision('highest'):
        ref = jax.block_until_ready(reference(sentence, words, mask, params))

    assert out.shape == (BATCH,)
    assert bool(jnp.all(jnp.isfinite(out)))
    assert jnp.allclose(out, ref, rtol=2e-3, atol=2e-3), (out, ref)
    print("KERNEL_OK")
</pallas_src>

<mosaic_0001>
module attributes {stable_mosaic.version = 11 : i64} {
  func.func @fused_kernel(%arg0: memref<2x8x32xf32, #tpu.memory_space<vmem>>, %arg1: memref<2x32xf32, #tpu.memory_space<vmem>>, %arg2: memref<2x8x1xf32, #tpu.memory_space<vmem>>, %arg3: memref<160x128xf32, #tpu.memory_space<vmem>>, %arg4: memref<8x128xf32, #tpu.memory_space<vmem>>, %arg5: memref<2x1xf32, #tpu.memory_space<vmem>>) attributes {dimension_semantics = [], scalar_prefetch = 0 : i64, scratch_operands = 0 : i64, tpu.core_type = #tpu.core_type<tc>} {
    %c0 = arith.constant 0 : index
    %c0_0 = arith.constant 0 : index
    %0 = vector.load %arg3[%c0, %c0_0] : memref<160x128xf32, #tpu.memory_space<vmem>>, vector<32x128xf32>
    %c32 = arith.constant 32 : index
    %c0_1 = arith.constant 0 : index
    %1 = vector.load %arg3[%c32, %c0_1] : memref<160x128xf32, #tpu.memory_space<vmem>>, vector<32x128xf32>
    %c64 = arith.constant 64 : index
    %c0_2 = arith.constant 0 : index
    %2 = vector.load %arg3[%c64, %c0_2] : memref<160x128xf32, #tpu.memory_space<vmem>>, vector<16x32xf32>
    %c80 = arith.constant 80 : index
    %c0_3 = arith.constant 0 : index
    %3 = vector.load %arg3[%c80, %c0_3] : memref<160x128xf32, #tpu.memory_space<vmem>>, vector<16x32xf32>
    %c96 = arith.constant 96 : index
    %c0_4 = arith.constant 0 : index
    %4 = vector.load %arg3[%c96, %c0_4] : memref<160x128xf32, #tpu.memory_space<vmem>>, vector<32x32xf32>
    %c128 = arith.constant 128 : index
    %c0_5 = arith.constant 0 : index
    %5 = vector.load %arg3[%c128, %c0_5] : memref<160x128xf32, #tpu.memory_space<vmem>>, vector<32x32xf32>
    %c0_6 = arith.constant 0 : index
    %c0_7 = arith.constant 0 : index
    %6 = vector.load %arg4[%c0_6, %c0_7] : memref<8x128xf32, #tpu.memory_space<vmem>>, vector<1x128xf32>
    %c1 = arith.constant 1 : index
    %c0_8 = arith.constant 0 : index
    %7 = vector.load %arg4[%c1, %c0_8] : memref<8x128xf32, #tpu.memory_space<vmem>>, vector<1x32xf32>
    %c2 = arith.constant 2 : index
    %c0_9 = arith.constant 0 : index
    %8 = vector.load %arg4[%c2, %c0_9] : memref<8x128xf32, #tpu.memory_space<vmem>>, vector<1x32xf32>
    %c3 = arith.constant 3 : index
    %c0_10 = arith.constant 0 : index
    %9 = vector.load %arg4[%c3, %c0_10] : memref<8x128xf32, #tpu.memory_space<vmem>>, vector<1x32xf32>
    %c4 = arith.constant 4 : index
    %c0_11 = arith.constant 0 : index
    %10 = vector.load %arg4[%c4, %c0_11] : memref<8x128xf32, #tpu.memory_space<vmem>>, vector<1x32xf32>
    %c5 = arith.constant 5 : index
    %c0_12 = arith.constant 0 : index
    %11 = vector.load %arg4[%c5, %c0_12] : memref<8x128xf32, #tpu.memory_space<vmem>>, vector<1x1xf32>
    %c0_13 = arith.constant 0 : index
    %c0_14 = arith.constant 0 : index
    %c0_15 = arith.constant 0 : index
    %12 = vector.load %arg0[%c0_13, %c0_14, %c0_15] : memref<2x8x32xf32, #tpu.memory_space<vmem>>, vector<2x8x32xf32>
    %13 = vector.shape_cast %0 : vector<32x128xf32> to vector<1x32x128xf32>
    %14 = vector.broadcast %13 : vector<1x32x128xf32> to vector<2x32x128xf32>
    "tpu.trace_start"() <{level = 10 : i32, message = "blh,bhg->blg"}> : () -> ()
    %cst = arith.constant dense<0.000000e+00> : vector<2x8x128xf32>
    %15 = tpu.matmul %12, %14, %cst {dimension_numbers = #tpu.dot_dimension_numbers<[2], [1], [1], [2], [0, 0, 0, 1, 1, 2], [0], [0]>, precision = #tpu.contract_precision<fp32>} : vector<2x8x32xf32>, vector<2x32x128xf32>, vector<2x8x128xf32> -> vector<2x8x128xf32>
    "tpu.trace_stop"() : () -> ()
    %16 = vector.shape_cast %6 : vector<1x128xf32> to vector<1x1x128xf32>
    %17 = vector.broadcast %16 : vector<1x1x128xf32> to vector<2x8x128xf32>
    %18 = arith.addf %15, %17 : vector<2x8x128xf32>
    %19 = tpu.iota {dimensions = array<i32: 1>} : vector<2x128xi32>
    %c31_i32 = arith.constant 31 : i32
    %20 = vector.broadcast %c31_i32 : i32 to vector<2x128xi32>
    %21 = arith.andi %19, %20 : vector<2x128xi32>
    %c16_i32 = arith.constant 16 : i32
    %22 = vector.broadcast %c16_i32 : i32 to vector<2x128xi32>
    %23 = arith.cmpi slt, %21, %22 : vector<2x128xi32>
    %24 = vector.extract_strided_slice %18 {offsets = [0, 0, 0], sizes = [2, 1, 128], strides = [1, 1, 1]} : vector<2x8x128xf32> to vector<2x1x128xf32>
    %25 = vector.shape_cast %24 : vector<2x1x128xf32> to vector<2x128xf32>
    %26 = vector.extract_strided_slice %18 {offsets = [0, 7, 0], sizes = [2, 1, 128], strides = [1, 1, 1]} : vector<2x8x128xf32> to vector<2x1x128xf32>
    %27 = vector.shape_cast %26 : vector<2x1x128xf32> to vector<2x128xf32>
    %28 = arith.select %23, %25, %27 : vector<2x128xi1>, vector<2x128xf32>
    %29 = vector.extract_strided_slice %18 {offsets = [0, 1, 0], sizes = [2, 1, 128], strides = [1, 1, 1]} : vector<2x8x128xf32> to vector<2x1x128xf32>
    %30 = vector.shape_cast %29 : vector<2x1x128xf32> to vector<2x128xf32>
    %31 = vector.extract_strided_slice %18 {offsets = [0, 6, 0], sizes = [2, 1, 128], strides = [1, 1, 1]} : vector<2x8x128xf32> to vector<2x1x128xf32>
    %32 = vector.shape_cast %31 : vector<2x1x128xf32> to vector<2x128xf32>
    %33 = arith.select %23, %30, %32 : vector<2x128xi1>, vector<2x128xf32>
    %34 = vector.extract_strided_slice %18 {offsets = [0, 2, 0], sizes = [2, 1, 128], strides = [1, 1, 1]} : vector<2x8x128xf32> to vector<2x1x128xf32>
    %35 = vector.shape_cast %34 : vector<2x1x128xf32> to vector<2x128xf32>
    %36 = vector.extract_strided_slice %18 {offsets = [0, 5, 0], sizes = [2, 1, 128], strides = [1, 1, 1]} : vector<2x8x128xf32> to vector<2x1x128xf32>
    %37 = vector.shape_cast %36 : vector<2x1x128xf32> to vector<2x128xf32>
    %38 = arith.select %23, %35, %37 : vector<2x128xi1>, vector<2x128xf32>
    %39 = vector.extract_strided_slice %18 {offsets = [0, 3, 0], sizes = [2, 1, 128], strides = [1, 1, 1]} : vector<2x8x128xf32> to vector<2x1x128xf32>
    %40 = vector.shape_cast %39 : vector<2x1x128xf32> to vector<2x128xf32>
    %41 = vector.extract_strided_slice %18 {offsets = [0, 4, 0], sizes = [2, 1, 128], strides = [1, 1, 1]} : vector<2x8x128xf32> to vector<2x1x128xf32>
    %42 = vector.shape_cast %41 : vector<2x1x128xf32> to vector<2x128xf32>
    %43 = arith.select %23, %40, %42 : vector<2x128xi1>, vector<2x128xf32>
    %44 = vector.extract_strided_slice %18 {offsets = [0, 4, 0], sizes = [2, 1, 128], strides = [1, 1, 1]} : vector<2x8x128xf32> to vector<2x1x128xf32>
    %45 = vector.shape_cast %44 : vector<2x1x128xf32> to vector<2x128xf32>
    %46 = vector.extract_strided_slice %18 {offsets = [0, 3, 0], sizes = [2, 1, 128], strides = [1, 1, 1]} : vector<2x8x128xf32> to vector<2x1x128xf32>
    %47 = vector.shape_cast %46 : vector<2x1x128xf32> to vector<2x128xf32>
    %48 = arith.select %23, %45, %47 : vector<2x128xi1>, vector<2x128xf32>
    %49 = vector.extract_strided_slice %18 {offsets = [0, 5, 0], sizes = [2, 1, 128], strides = [1, 1, 1]} : vector<2x8x128xf32> to vector<2x1x128xf32>
    %50 = vector.shape_cast %49 : vector<2x1x128xf32> to vector<2x128xf32>
    %51 = vector.extract_strided_slice %18 {offsets = [0, 2, 0], sizes = [2, 1, 128], strides = [1, 1, 1]} : vector<2x8x128xf32> to vector<2x1x128xf32>
    %52 = vector.shape_cast %51 : vector<2x1x128xf32> to vector<2x128xf32>
    %53 = arith.select %23, %50, %52 : vector<2x128xi1>, vector<2x128xf32>
    %54 = vector.extract_strided_slice %18 {offsets = [0, 6, 0], sizes = [2, 1, 128], strides = [1, 1, 1]} : vector<2x8x128xf32> to vector<2x1x128xf32>
    %55 = vector.shape_cast %54 : vector<2x1x128xf32> to vector<2x128xf32>
    %56 = vector.extract_strided_slice %18 {offsets = [0, 1, 0], sizes = [2, 1, 128], strides = [1, 1, 1]} : vector<2x8x128xf32> to vector<2x1x128xf32>
    %57 = vector.shape_cast %56 : vector<2x1x128xf32> to vector<2x128xf32>
    %58 = arith.select %23, %55, %57 : vector<2x128xi1>, vector<2x128xf32>
    %59 = vector.extract_strided_slice %18 {offsets = [0, 7, 0], sizes = [2, 1, 128], strides = [1, 1, 1]} : vector<2x8x128xf32> to vector<2x1x128xf32>
    %60 = vector.shape_cast %59 : vector<2x1x128xf32> to vector<2x128xf32>
    %61 = vector.extract_strided_slice %18 {offsets = [0, 0, 0], sizes = [2, 1, 128], strides = [1, 1, 1]} : vector<2x8x128xf32> to vector<2x1x128xf32>
    %62 = vector.shape_cast %61 : vector<2x1x128xf32> to vector<2x128xf32>
    %63 = arith.select %23, %60, %62 : vector<2x128xi1>, vector<2x128xf32>
    %cst_16 = arith.constant 0.000000e+00 : f32
    %64 = vector.broadcast %cst_16 : f32 to vector<2x32xf32>
    %cst_17 = arith.constant 0.000000e+00 : f32
    %65 = vector.broadcast %cst_17 : f32 to vector<2x32xf32>
    %cst_18 = arith.constant dense<0.000000e+00> : vector<2x128xf32>
    %66 = tpu.matmul %64, %1, %cst_18 {dimension_numbers = #tpu.dot_dimension_numbers<[1], [0], [0], [1], [0, 0, 1, 1], [], []>} : vector<2x32xf32>, vector<32x128xf32>, vector<2x128xf32> -> vector<2x128xf32>
    %67 = arith.addf %28, %66 : vector<2x128xf32>
    %68 = arith.negf %67 : vector<2x128xf32>
    %69 = math.exp %68 : vector<2x128xf32>
    %cst_19 = arith.constant 1.000000e+00 : f32
    %70 = vector.broadcast %cst_19 : f32 to vector<2x128xf32>
    %71 = arith.addf %70, %69 : vector<2x128xf32>
    %72 = arith.divf %70, %71 : vector<2x128xf32>
    %73 = math.tanh %67 : vector<2x128xf32>
    %74 = vector.extract_strided_slice %72 {offsets = [0, 0], sizes = [2, 32], strides = [1, 1]} : vector<2x128xf32> to vector<2x32xf32>
    %75 = vector.extract_strided_slice %72 {offsets = [0, 32], sizes = [2, 32], strides = [1, 1]} : vector<2x128xf32> to vector<2x32xf32>
    %76 = vector.extract_strided_slice %73 {offsets = [0, 64], sizes = [2, 32], strides = [1, 1]} : vector<2x128xf32> to vector<2x32xf32>
    %77 = vector.extract_strided_slice %72 {offsets = [0, 96], sizes = [2, 32], strides = [1, 1]} : vector<2x128xf32> to vector<2x32xf32>
    %78 = arith.mulf %75, %65 : vector<2x32xf32>
    %79 = arith.mulf %74, %76 : vector<2x32xf32>
    %80 = arith.addf %78, %79 : vector<2x32xf32>
    %81 = math.tanh %80 : vector<2x32xf32>
    %82 = arith.mulf %77, %81 : vector<2x32xf32>
    %83 = vector.extract_strided_slice %82 {offsets = [0, 0], sizes = [2, 16], strides = [1, 1]} : vector<2x32xf32> to vector<2x16xf32>
    %84 = vector.extract_strided_slice %82 {offsets = [0, 16], sizes = [2, 16], strides = [1, 1]} : vector<2x32xf32> to vector<2x16xf32>
    %cst_20 = arith.constant dense<0.000000e+00> : vector<2x128xf32>
    %85 = tpu.matmul %82, %1, %cst_20 {dimension_numbers = #tpu.dot_dimension_numbers<[1], [0], [0], [1], [0, 0, 1, 1], [], []>} : vector<2x32xf32>, vector<32x128xf32>, vector<2x128xf32> -> vector<2x128xf32>
    %86 = arith.addf %33, %85 : vector<2x128xf32>
    %87 = arith.negf %86 : vector<2x128xf32>
    %88 = math.exp %87 : vector<2x128xf32>
    %cst_21 = arith.constant 1.000000e+00 : f32
    %89 = vector.broadcast %cst_21 : f32 to vector<2x128xf32>
    %90 = arith.addf %89, %88 : vector<2x128xf32>
    %91 = arith.divf %89, %90 : vector<2x128xf32>
    %92 = math.tanh %86 : vector<2x128xf32>
    %93 = vector.extract_strided_slice %91 {offsets = [0, 0], sizes = [2, 32], strides = [1, 1]} : vector<2x128xf32> to vector<2x32xf32>
    %94 = vector.extract_strided_slice %91 {offsets = [0, 32], sizes = [2, 32], strides = [1, 1]} : vector<2x128xf32> to vector<2x32xf32>
    %95 = vector.extract_strided_slice %92 {offsets = [0, 64], sizes = [2, 32], strides = [1, 1]} : vector<2x128xf32> to vector<2x32xf32>
    %96 = vector.extract_strided_slice %91 {offsets = [0, 96], sizes = [2, 32], strides = [1, 1]} : vector<2x128xf32> to vector<2x32xf32>
    %97 = arith.mulf %94, %80 : vector<2x32xf32>
    %98 = arith.mulf %93, %95 : vector<2x32xf32>
    %99 = arith.addf %97, %98 : vector<2x32xf32>
    %100 = math.tanh %99 : vector<2x32xf32>
    %101 = arith.mulf %96, %100 : vector<2x32xf32>
    %102 = vector.extract_strided_slice %101 {offsets = [0, 0], sizes = [2, 16], strides = [1, 1]} : vector<2x32xf32> to vector<2x16xf32>
    %103 = vector.extract_strided_slice %101 {offsets = [0, 16], sizes = [2, 16], strides = [1, 1]} : vector<2x32xf32> to vector<2x16xf32>
    %cst_22 = arith.constant dense<0.000000e+00> : vector<2x128xf32>
    %104 = tpu.matmul %101, %1, %cst_22 {dimension_numbers = #tpu.dot_dimension_numbers<[1], [0], [0], [1], [0, 0, 1, 1], [], []>} : vector<2x32xf32>, vector<32x128xf32>, vector<2x128xf32> -> vector<2x128xf32>
    %105 = arith.addf %38, %104 : vector<2x128xf32>
    %106 = arith.negf %105 : vector<2x128xf32>
    %107 = math.exp %106 : vector<2x128xf32>
    %cst_23 = arith.constant 1.000000e+00 : f32
    %108 = vector.broadcast %cst_23 : f32 to vector<2x128xf32>
    %109 = arith.addf %108, %107 : vector<2x128xf32>
    %110 = arith.divf %108, %109 : vector<2x128xf32>
    %111 = math.tanh %105 : vector<2x128xf32>
    %112 = vector.extract_strided_slice %110 {offsets = [0, 0], sizes = [2, 32], strides = [1, 1]} : vector<2x128xf32> to vector<2x32xf32>
    %113 = vector.extract_strided_slice %110 {offsets = [0, 32], sizes = [2, 32], strides = [1, 1]} : vector<2x128xf32> to vector<2x32xf32>
    %114 = vector.extract_strided_slice %111 {offsets = [0, 64], sizes = [2, 32], strides = [1, 1]} : vector<2x128xf32> to vector<2x32xf32>
    %115 = vector.extract_strided_slice %110 {offsets = [0, 96], sizes = [2, 32], strides = [1, 1]} : vector<2x128xf32> to vector<2x32xf32>
    %116 = arith.mulf %113, %99 : vector<2x32xf32>
    %117 = arith.mulf %112, %114 : vector<2x32xf32>
    %118 = arith.addf %116, %117 : vector<2x32xf32>
    %119 = math.tanh %118 : vector<2x32xf32>
    %120 = arith.mulf %115, %119 : vector<2x32xf32>
    %121 = vector.extract_strided_slice %120 {offsets = [0, 0], sizes = [2, 16], strides = [1, 1]} : vector<2x32xf32> to vector<2x16xf32>
    %122 = vector.extract_strided_slice %120 {offsets = [0, 16], sizes = [2, 16], strides = [1, 1]} : vector<2x32xf32> to vector<2x16xf32>
    %cst_24 = arith.constant dense<0.000000e+00> : vector<2x128xf32>
    %123 = tpu.matmul %120, %1, %cst_24 {dimension_numbers = #tpu.dot_dimension_numbers<[1], [0], [0], [1], [0, 0, 1, 1], [], []>} : vector<2x32xf32>, vector<32x128xf32>, vector<2x128xf32> -> vector<2x128xf32>
    %124 = arith.addf %43, %123 : vector<2x128xf32>
    %125 = arith.negf %124 : vector<2x128xf32>
    %126 = math.exp %125 : vector<2x128xf32>
    %cst_25 = arith.constant 1.000000e+00 : f32
    %127 = vector.broadcast %cst_25 : f32 to vector<2x128xf32>
    %128 = arith.addf %127, %126 : vector<2x128xf32>
    %129 = arith.divf %127, %128 : vector<2x128xf32>
    %130 = math.tanh %124 : vector<2x128xf32>
    %131 = vector.extract_strided_slice %129 {offsets = [0, 0], sizes = [2, 32], strides = [1, 1]} : vector<2x128xf32> to vector<2x32xf32>
    %132 = vector.extract_strided_slice %129 {offsets = [0, 32], sizes = [2, 32], strides = [1, 1]} : vector<2x128xf32> to vector<2x32xf32>
    %133 = vector.extract_strided_slice %130 {offsets = [0, 64], sizes = [2, 32], strides = [1, 1]} : vector<2x128xf32> to vector<2x32xf32>
    %134 = vector.extract_strided_slice %129 {offsets = [0, 96], sizes = [2, 32], strides = [1, 1]} : vector<2x128xf32> to vector<2x32xf32>
    %135 = arith.mulf %132, %118 : vector<2x32xf32>
    %136 = arith.mulf %131, %133 : vector<2x32xf32>
    %137 = arith.addf %135, %136 : vector<2x32xf32>
    %138 = math.tanh %137 : vector<2x32xf32>
    %139 = arith.mulf %134, %138 : vector<2x32xf32>
    %140 = vector.extract_strided_slice %139 {offsets = [0, 0], sizes = [2, 16], strides = [1, 1]} : vector<2x32xf32> to vector<2x16xf32>
    %141 = vector.extract_strided_slice %139 {offsets = [0, 16], sizes = [2, 16], strides = [1, 1]} : vector<2x32xf32> to vector<2x16xf32>
    %cst_26 = arith.constant dense<0.000000e+00> : vector<2x128xf32>
    %142 = tpu.matmul %139, %1, %cst_26 {dimension_numbers = #tpu.dot_dimension_numbers<[1], [0], [0], [1], [0, 0, 1, 1], [], []>} : vector<2x32xf32>, vector<32x128xf32>, vector<2x128xf32> -> vector<2x128xf32>
    %143 = arith.addf %48, %142 : vector<2x128xf32>
    %144 = arith.negf %143 : vector<2x128xf32>
    %145 = math.exp %144 : vector<2x128xf32>
    %cst_27 = arith.constant 1.000000e+00 : f32
    %146 = vector.broadcast %cst_27 : f32 to vector<2x128xf32>
    %147 = arith.addf %146, %145 : vector<2x128xf32>
    %148 = arith.divf %146, %147 : vector<2x128xf32>
    %149 = math.tanh %143 : vector<2x128xf32>
    %150 = vector.extract_strided_slice %148 {offsets = [0, 0], sizes = [2, 32], strides = [1, 1]} : vector<2x128xf32> to vector<2x32xf32>
    %151 = vector.extract_strided_slice %148 {offsets = [0, 32], sizes = [2, 32], strides = [1, 1]} : vector<2x128xf32> to vector<2x32xf32>
    %152 = vector.extract_strided_slice %149 {offsets = [0, 64], sizes = [2, 32], strides = [1, 1]} : vector<2x128xf32> to vector<2x32xf32>
    %153 = vector.extract_strided_slice %148 {offsets = [0, 96], sizes = [2, 32], strides = [1, 1]} : vector<2x128xf32> to vector<2x32xf32>
    %154 = arith.mulf %151, %137 : vector<2x32xf32>
    %155 = arith.mulf %150, %152 : vector<2x32xf32>
    %156 = arith.addf %154, %155 : vector<2x32xf32>
    %157 = math.tanh %156 : vector<2x32xf32>
    %158 = arith.mulf %153, %157 : vector<2x32xf32>
    %159 = vector.extract_strided_slice %158 {offsets = [0, 0], sizes = [2, 16], strides = [1, 1]} : vector<2x32xf32> to vector<2x16xf32>
    %160 = vector.extract_strided_slice %158 {offsets = [0, 16], sizes = [2, 16], strides = [1, 1]} : vector<2x32xf32> to vector<2x16xf32>
    %cst_28 = arith.constant dense<0.000000e+00> : vector<2x128xf32>
    %161 = tpu.matmul %158, %1, %cst_28 {dimension_numbers = #tpu.dot_dimension_numbers<[1], [0], [0], [1], [0, 0, 1, 1], [], []>} : vector<2x32xf32>, vector<32x128xf32>, vector<2x128xf32> -> vector<2x128xf32>
    %162 = arith.addf %53, %161 : vector<2x128xf32>
    %163 = arith.negf %162 : vector<2x128xf32>
    %164 = math.exp %163 : vector<2x128xf32>
    %cst_29 = arith.constant 1.000000e+00 : f32
    %165 = vector.broadcast %cst_29 : f32 to vector<2x128xf32>
    %166 = arith.addf %165, %164 : vector<2x128xf32>
    %167 = arith.divf %165, %166 : vector<2x128xf32>
    %168 = math.tanh %162 : vector<2x128xf32>
    %169 = vector.extract_strided_slice %167 {offsets = [0, 0], sizes = [2, 32], strides = [1, 1]} : vector<2x128xf32> to vector<2x32xf32>
    %170 = vector.extract_strided_slice %167 {offsets = [0, 32], sizes = [2, 32], strides = [1, 1]} : vector<2x128xf32> to vector<2x32xf32>
    %171 = vector.extract_strided_slice %168 {offsets = [0, 64], sizes = [2, 32], strides = [1, 1]} : vector<2x128xf32> to vector<2x32xf32>
    %172 = vector.extract_strided_slice %167 {offsets = [0, 96], sizes = [2, 32], strides = [1, 1]} : vector<2x128xf32> to vector<2x32xf32>
    %173 = arith.mulf %170, %156 : vector<2x32xf32>
    %174 = arith.mulf %169, %171 : vector<2x32xf32>
    %175 = arith.addf %173, %174 : vector<2x32xf32>
    %176 = math.tanh %175 : vector<2x32xf32>
    %177 = arith.mulf %172, %176 : vector<2x32xf32>
    %178 = vector.extract_strided_slice %177 {offsets = [0, 0], sizes = [2, 16], strides = [1, 1]} : vector<2x32xf32> to vector<2x16xf32>
    %179 = vector.extract_strided_slice %177 {offsets = [0, 16], sizes = [2, 16], strides = [1, 1]} : vector<2x32xf32> to vector<2x16xf32>
    %cst_30 = arith.constant dense<0.000000e+00> : vector<2x128xf32>
    %180 = tpu.matmul %177, %1, %cst_30 {dimension_numbers = #tpu.dot_dimension_numbers<[1], [0], [0], [1], [0, 0, 1, 1], [], []>} : vector<2x32xf32>, vector<32x128xf32>, vector<2x128xf32> -> vector<2x128xf32>
    %181 = arith.addf %58, %180 : vector<2x128xf32>
    %182 = arith.negf %181 : vector<2x128xf32>
    %183 = math.exp %182 : vector<2x128xf32>
    %cst_31 = arith.constant 1.000000e+00 : f32
    %184 = vector.broadcast %cst_31 : f32 to vector<2x128xf32>
    %185 = arith.addf %184, %183 : vector<2x128xf32>
    %186 = arith.divf %184, %185 : vector<2x128xf32>
    %187 = math.tanh %181 : vector<2x128xf32>
    %188 = vector.extract_strided_slice %186 {offsets = [0, 0], sizes = [2, 32], strides = [1, 1]} : vector<2x128xf32> to vector<2x32xf32>
    %189 = vector.extract_strided_slice %186 {offsets = [0, 32], sizes = [2, 32], strides = [1, 1]} : vector<2x128xf32> to vector<2x32xf32>
    %190 = vector.extract_strided_slice %187 {offsets = [0, 64], sizes = [2, 32], strides = [1, 1]} : vector<2x128xf32> to vector<2x32xf32>
    %191 = vector.extract_strided_slice %186 {offsets = [0, 96], sizes = [2, 32], strides = [1, 1]} : vector<2x128xf32> to vector<2x32xf32>
    %192 = arith.mulf %189, %175 : vector<2x32xf32>
    %193 = arith.mulf %188, %190 : vector<2x32xf32>
    %194 = arith.addf %192, %193 : vector<2x32xf32>
    %195 = math.tanh %194 : vector<2x32xf32>
    %196 = arith.mulf %191, %195 : vector<2x32xf32>
    %197 = vector.extract_strided_slice %196 {offsets = [0, 0], sizes = [2, 16], strides = [1, 1]} : vector<2x32xf32> to vector<2x16xf32>
    %198 = vector.extract_strided_slice %196 {offsets = [0, 16], sizes = [2, 16], strides = [1, 1]} : vector<2x32xf32> to vector<2x16xf32>
    %cst_32 = arith.constant dense<0.000000e+00> : vector<2x128xf32>
    %199 = tpu.matmul %196, %1, %cst_32 {dimension_numbers = #tpu.dot_dimension_numbers<[1], [0], [0], [1], [0, 0, 1, 1], [], []>} : vector<2x32xf32>, vector<32x128xf32>, vector<2x128xf32> -> vector<2x128xf32>
    %200 = arith.addf %63, %199 : vector<2x128xf32>
    %201 = arith.negf %200 : vector<2x128xf32>
    %202 = math.exp %201 : vector<2x128xf32>
    %cst_33 = arith.constant 1.000000e+00 : f32
    %203 = vector.broadcast %cst_33 : f32 to vector<2x128xf32>
    %204 = arith.addf %203, %202 : vector<2x128xf32>
    %205 = arith.divf %203, %204 : vector<2x128xf32>
    %206 = math.tanh %200 : vector<2x128xf32>
    %207 = vector.extract_strided_slice %205 {offsets = [0, 0], sizes = [2, 32], strides = [1, 1]} : vector<2x128xf32> to vector<2x32xf32>
    %208 = vector.extract_strided_slice %205 {offsets = [0, 32], sizes = [2, 32], strides = [1, 1]} : vector<2x128xf32> to vector<2x32xf32>
    %209 = vector.extract_strided_slice %206 {offsets = [0, 64], sizes = [2, 32], strides = [1, 1]} : vector<2x128xf32> to vector<2x32xf32>
    %210 = vector.extract_strided_slice %205 {offsets = [0, 96], sizes = [2, 32], strides = [1, 1]} : vector<2x128xf32> to vector<2x32xf32>
    %211 = arith.mulf %208, %194 : vector<2x32xf32>
    %212 = arith.mulf %207, %209 : vector<2x32xf32>
    %213 = arith.addf %211, %212 : vector<2x32xf32>
    %214 = math.tanh %213 : vector<2x32xf32>
    %215 = arith.mulf %210, %214 : vector<2x32xf32>
    %216 = vector.extract_strided_slice %215 {offsets = [0, 0], sizes = [2, 16], strides = [1, 1]} : vector<2x32xf32> to vector<2x16xf32>
    %217 = vector.extract_strided_slice %215 {offsets = [0, 16], sizes = [2, 16], strides = [1, 1]} : vector<2x32xf32> to vector<2x16xf32>
    %218 = vector.shape_cast %83 : vector<2x16xf32> to vector<2x1x16xf32>
    %219 = vector.shape_cast %102 : vector<2x16xf32> to vector<2x1x16xf32>
    %220 = vector.shape_cast %121 : vector<2x16xf32> to vector<2x1x16xf32>
    %221 = vector.shape_cast %140 : vector<2x16xf32> to vector<2x1x16xf32>
    %222 = vector.shape_cast %159 : vector<2x16xf32> to vector<2x1x16xf32>
    %223 = vector.shape_cast %178 : vector<2x16xf32> to vector<2x1x16xf32>
    %224 = vector.shape_cast %197 : vector<2x16xf32> to vector<2x1x16xf32>
    %225 = vector.shape_cast %216 : vector<2x16xf32> to vector<2x1x16xf32>
    %226 = tpu.concatenate %218, %219, %220, %221, %222, %223, %224, %225 in 1 : vector<2x1x16xf32>, vector<2x1x16xf32>, vector<2x1x16xf32>, vector<2x1x16xf32>, vector<2x1x16xf32>, vector<2x1x16xf32>, vector<2x1x16xf32>, vector<2x1x16xf32> -> vector<2x8x16xf32>
    %227 = vector.shape_cast %217 : vector<2x16xf32> to vector<2x1x16xf32>
    %228 = vector.shape_cast %198 : vector<2x16xf32> to vector<2x1x16xf32>
    %229 = vector.shape_cast %179 : vector<2x16xf32> to vector<2x1x16xf32>
    %230 = vector.shape_cast %160 : vector<2x16xf32> to vector<2x1x16xf32>
    %231 = vector.shape_cast %141 : vector<2x16xf32> to vector<2x1x16xf32>
    %232 = vector.shape_cast %122 : vector<2x16xf32> to vector<2x1x16xf32>
    %233 = vector.shape_cast %103 : vector<2x16xf32> to vector<2x1x16xf32>
    %234 = vector.shape_cast %84 : vector<2x16xf32> to vector<2x1x16xf32>
    %235 = tpu.concatenate %227, %228, %229, %230, %231, %232, %233, %234 in 1 : vector<2x1x16xf32>, vector<2x1x16xf32>, vector<2x1x16xf32>, vector<2x1x16xf32>, vector<2x1x16xf32>, vector<2x1x16xf32>, vector<2x1x16xf32>, vector<2x1x16xf32> -> vector<2x8x16xf32>
    %236 = vector.shape_cast %2 : vector<16x32xf32> to vector<1x16x32xf32>
    %237 = vector.broadcast %236 : vector<1x16x32xf32> to vector<2x16x32xf32>
    "tpu.trace_start"() <{level = 10 : i32, message = "blf,bfh->blh"}> : () -> ()
    %cst_34 = arith.constant dense<0.000000e+00> : vector<2x8x32xf32>
    %238 = tpu.matmul %226, %237, %cst_34 {dimension_numbers = #tpu.dot_dimension_numbers<[2], [1], [1], [2], [0, 0, 0, 1, 1, 2], [0], [0]>} : vector<2x8x16xf32>, vector<2x16x32xf32>, vector<2x8x32xf32> -> vector<2x8x32xf32>
    "tpu.trace_stop"() : () -> ()
    %239 = vector.shape_cast %3 : vector<16x32xf32> to vector<1x16x32xf32>
    %240 = vector.broadcast %239 : vector<1x16x32xf32> to vector<2x16x32xf32>
    "tpu.trace_start"() <{level = 10 : i32, message = "blf,bfh->blh"}> : () -> ()
    %cst_35 = arith.constant dense<0.000000e+00> : vector<2x8x32xf32>
    %241 = tpu.matmul %235, %240, %cst_35 {dimension_numbers = #tpu.dot_dimension_numbers<[2], [1], [1], [2], [0, 0, 0, 1, 1, 2], [0], [0]>} : vector<2x8x16xf32>, vector<2x16x32xf32>, vector<2x8x32xf32> -> vector<2x8x32xf32>
    "tpu.trace_stop"() : () -> ()
    %242 = arith.addf %238, %241 : vector<2x8x32xf32>
    %243 = vector.shape_cast %7 : vector<1x32xf32> to vector<1x1x32xf32>
    %244 = vector.broadcast %243 : vector<1x1x32xf32> to vector<2x8x32xf32>
    %245 = arith.addf %242, %244 : vector<2x8x32xf32>
    %246 = math.tanh %245 : vector<2x8x32xf32>
    %247 = vector.shape_cast %4 : vector<32x32xf32> to vector<1x32x32xf32>
    %248 = vector.broadcast %247 : vector<1x32x32xf32> to vector<2x32x32xf32>
    "tpu.trace_start"() <{level = 10 : i32, message = "blh,bhk->blk"}> : () -> ()
    %cst_36 = arith.constant dense<0.000000e+00> : vector<2x8x32xf32>
    %249 = tpu.matmul %246, %248, %cst_36 {dimension_numbers = #tpu.dot_dimension_numbers<[2], [1], [1], [2], [0, 0, 0, 1, 1, 2], [0], [0]>} : vector<2x8x32xf32>, vector<2x32x32xf32>, vector<2x8x32xf32> -> vector<2x8x32xf32>
    "tpu.trace_stop"() : () -> ()
    %250 = vector.shape_cast %8 : vector<1x32xf32> to vector<1x1x32xf32>
    %251 = vector.broadcast %250 : vector<1x1x32xf32> to vector<2x8x32xf32>
    %252 = arith.addf %249, %251 : vector<2x8x32xf32>
    %c0_37 = arith.constant 0 : index
    %c0_38 = arith.constant 0 : index
    %253 = vector.load %arg1[%c0_37, %c0_38] : memref<2x32xf32, #tpu.memory_space<vmem>>, vector<2x32xf32>
    %cst_39 = arith.constant dense<0.000000e+00> : vector<2x32xf32>
    %254 = tpu.matmul %253, %5, %cst_39 {dimension_numbers = #tpu.dot_dimension_numbers<[1], [0], [0], [1], [0, 0, 1, 1], [], []>} : vector<2x32xf32>, vector<32x32xf32>, vector<2x32xf32> -> vector<2x32xf32>
    %255 = vector.shape_cast %254 : vector<2x32xf32> to vector<2x1x32xf32>
    %256 = vector.broadcast %255 : vector<2x1x32xf32> to vector<2x8x32xf32>
    %257 = arith.mulf %256, %252 : vector<2x8x32xf32>
    %cst_40 = arith.constant dense<0.000000e+00> : vector<2x8xf32>
    %258 = vector.multi_reduction <add>, %257, %cst_40 [2] : vector<2x8x32xf32> to vector<2x8xf32>
    %259 = vector.shape_cast %258 : vector<2x8xf32> to vector<2x8x1xf32>
    %c0_41 = arith.constant 0 : index
    %c0_42 = arith.constant 0 : index
    %c0_43 = arith.constant 0 : index
    %260 = vector.load %arg2[%c0_41, %c0_42, %c0_43] : memref<2x8x1xf32, #tpu.memory_space<vmem>>, vector<2x8x1xf32>
    %261 = arith.addf %259, %260 : vector<2x8x1xf32>
    %cst_44 = arith.constant dense<0xFF800000> : vector<2x1xf32>
    %262 = vector.multi_reduction <maximumf>, %261, %cst_44 [1] : vector<2x8x1xf32> to vector<2x1xf32>
    %263 = vector.shape_cast %262 : vector<2x1xf32> to vector<2x1x1xf32>
    %264 = vector.broadcast %263 : vector<2x1x1xf32> to vector<2x8x1xf32>
    %265 = arith.subf %261, %264 : vector<2x8x1xf32>
    %266 = math.exp %265 : vector<2x8x1xf32>
    %cst_45 = arith.constant dense<0.000000e+00> : vector<2x1xf32>
    %267 = vector.multi_reduction <add>, %266, %cst_45 [1] : vector<2x8x1xf32> to vector<2x1xf32>
    %268 = vector.shape_cast %267 : vector<2x1xf32> to vector<2x1x1xf32>
    %269 = vector.broadcast %268 : vector<2x1x1xf32> to vector<2x8x1xf32>
    %270 = arith.divf %266, %269 : vector<2x8x1xf32>
    %271 = vector.broadcast %270 : vector<2x8x1xf32> to vector<2x8x32xf32>
    %272 = arith.mulf %271, %252 : vector<2x8x32xf32>
    %cst_46 = arith.constant dense<0.000000e+00> : vector<2x32xf32>
    %273 = vector.multi_reduction <add>, %272, %cst_46 [1] : vector<2x8x32xf32> to vector<2x32xf32>
    %274 = vector.shape_cast %273 : vector<2x32xf32> to vector<2x1x32xf32>
    %275 = vector.shape_cast %9 : vector<1x32xf32> to vector<1x1x32xf32>
    %276 = vector.broadcast %275 : vector<1x1x32xf32> to vector<2x1x32xf32>
    %277 = arith.mulf %274, %276 : vector<2x1x32xf32>
    %278 = vector.shape_cast %253 : vector<2x32xf32> to vector<2x1x32xf32>
    %279 = vector.shape_cast %10 : vector<1x32xf32> to vector<1x1x32xf32>
    %280 = vector.broadcast %279 : vector<1x1x32xf32> to vector<2x1x32xf32>
    %281 = arith.mulf %278, %280 : vector<2x1x32xf32>
    %282 = arith.addf %277, %281 : vector<2x1x32xf32>
    %cst_47 = arith.constant dense<0.000000e+00> : vector<2x1xf32>
    %283 = vector.multi_reduction <add>, %282, %cst_47 [2] : vector<2x1x32xf32> to vector<2x1xf32>
    %284 = vector.shape_cast %283 : vector<2x1xf32> to vector<2x1x1xf32>
    %285 = vector.shape_cast %11 : vector<1x1xf32> to vector<1x1x1xf32>
    %286 = vector.broadcast %285 : vector<1x1x1xf32> to vector<2x1x1xf32>
    %287 = arith.addf %284, %286 : vector<2x1x1xf32>
    %288 = vector.shape_cast %287 : vector<2x1x1xf32> to vector<2x1xf32>
    %289 = arith.negf %288 : vector<2x1xf32>
    %290 = math.exp %289 : vector<2x1xf32>
    %cst_48 = arith.constant 1.000000e+00 : f32
    %291 = vector.broadcast %cst_48 : f32 to vector<2x1xf32>
    %292 = arith.addf %291, %290 : vector<2x1xf32>
    %293 = arith.divf %291, %292 : vector<2x1xf32>
    %c0_49 = arith.constant 0 : index
    %c0_50 = arith.constant 0 : index
    %294 = vector.load %arg5[%c0_49, %c0_50] : memref<2x1xf32, #tpu.memory_space<vmem>>, vector<2x1xf32>
    tpu.vector_store %arg5[%c0_49, %c0_50], %293 {strides = array<i32>} : memref<2x1xf32, #tpu.memory_space<vmem>>, vector<2x1xf32>,
    return
  }
}

</mosaic_0001>

<bundles_post_ra>
// kernel: word_attention_feature.1
= control target key start
LH: loop header
LB: loop body
LE: loop exit
PB: predicated region body
PF: predicated region fallthrough
CT: control target
= control target key end

     0   :  { %10 = vsyncpa [#allocation3], 0  ;;  %s2024_s0 = inlined_call_operand.vmem [shape: f32[2,8,32], index: 0, kind: input, shape index: {}]   ;;  %s2025_s1 = inlined_call_operand.hbm [shape: f32[2,32], index: 1, kind: input, shape index: {}]   ;;  %s2026_s2 = inlined_call_operand.vmem [shape: f32[2,8,1], index: 2, kind: input, shape index: {}]   ;;  %s2027_s3 = inlined_call_operand.hbm [shape: f32[160,128], index: 3, kind: input, shape index: {}]   ;;  %s2028_s4 = inlined_call_operand.vmem [shape: f32[8,128], index: 4, kind: input, shape index: {}]   ;;  %s2029_s5 = inlined_call_operand.vmem [shape: f32[2,1], index: 5, kind: output, shape index: {}]  }
   0x1   :  { %s19_s20 = sshll.u32 %s2025_s1, 4  ;;  %s20_s20 = int_to_ptr.hbm [resolvable:$true] %s19_s20 }
   0x2   :  { %11 = vsyncpa [#allocation5], 0  ;;  %s1609_s21 = smov [#allocation2]   ;;  %s31_s25 = sshll.u32 %s2027_s3, 4  ;;  %s32_s25 = int_to_ptr.hbm [resolvable:$true] %s31_s25 }
   0x3   :  { %s21_s22 = sshll.u32 %s1609_s21, 4  ;;  %s1610_s26 = smov [#allocation4]   ;;  %s22_s22 = int_to_ptr.vmem [resolvable:$true] %s21_s22 }
   0x4   :  { %24 = dma.hbm_to_vmem [thread:$0]  %s20_s20, 32, %s22_s22, [#allocation3]  }
   0x5   :  { %s33_s27 = sshll.u32 %s1610_s26, 4  ;;  %s1611_s28 = smov 128   ;;  %s34_s27 = int_to_ptr.vmem [resolvable:$true] %s33_s27 }
   0x6   :  { %s1612_s29 = smov 8  }
   0x7   :  { %39 = dma.hbm_to_vmem [thread:$0]  %s32_s25, 2560, %s34_s27, [#allocation5], %s1611_s28, %s1611_s28, %s1612_s29  }
   0x8   :  { %1605 = dma.done.wait [#allocation3], 32  }
   0x9   :  { %1606 = vsyncadd [#allocation3], 4294967264 }
   0xa   :  { %1607 = dma.done.wait [#allocation5], 2560  }
   0xb   :  { %1608 = vsyncadd [#allocation5], 4294964736  ;;  %vm79_vm0 = vcmask 261120   ;;  %v53_v0 = vld [vmem:[#allocation4 + $0x18] sm:$0xff]  ;;  %v52_v1 = vld [vmem:[#allocation4 + $0x10] sm:$0xff]  ;;  %v1613_v42 = vmov 0.0   ;;  %v456_v56 = vlaneseq }
   0xc   :  { %v51_v2 = vld [vmem:[#allocation4 + $0x8] sm:$0xff]  ;;  %v1654_v3 = vand.u32 4294901760, %v53_v0  ;;  %v1656_v4 = vand.u32 4294901760, %v52_v1  ;;  %v50_v6 = vld [vmem:[#allocation4] sm:$0xff]  ;;  %v57_v38 = vld [vmem:[#allocation4 + $0x38] sm:$0xff]  ;;  %vm463_vm1 = vcmask 1041409  }
   0xd   :  { %v1658_v5 = vand.u32 4294901760, %v51_v2  ;;  %v76_v7 = vld [vmem:[%s2024_s0] sm:$0xff]  ;;  %v77_v8 = vld [vmem:[%s2024_s0 + $0x8] sm:$0xff]  ;;  %v1666_v9 = vand.u32 4294901760, %v50_v6  ;;  %v56_v39 = vld [vmem:[#allocation4 + $0x30] sm:$0xff]  ;;  %v457_v61 = vand.u32 127, %v456_v56 }
   0xe   :  { %v81_v10 = vsel %vm79_vm0, %v76_v7, 0  ;;  %v269_v11 = vsel %vm79_vm0, %v77_v8, 0  ;;  %v1671_v12 = vsub.f32 %v53_v0, %v1654_v3  ;;  %96 = vmatpush.msra.mxu0 %v1654_v3  ;;  %v1675_v13 = vsub.f32 %v52_v1, %v1656_v4  ;;  %196 = vmatpush.msra.mxu3 %v1654_v3  ;;  %v55_v40 = vld [vmem:[#allocation4 + $0x28] sm:$0xff]  ;;  %v54_v41 = vld [vmem:[#allocation4 + $0x20] sm:$0xff]  ;;  %v1470_v43 = vld [vmem:[%s2028_s4] ss:$0 sm:$0xff] }
   0xf   :  { %v1679_v14 = vsub.f32 %v51_v2, %v1658_v5  ;;  %v1681_v15 = vand.u32 4294901760, %v81_v10  ;;  %v1684_v16 = vsub.f32 %v50_v6, %v1666_v9  ;;  %v1686_v17 = vand.u32 4294901760, %v269_v11  ;;  %s1614_s8 = smov 64   ;;  %s1615_s9 = smov 32  }
  0x10   :  { %167 = vmatpush.msra.mxu2 %v1671_v12  ;;  %98 = vmatpush.msra.mxu0 %v1656_v4  ;;  %v126_v18 = vand.u32 4294901760, %v1671_v12  ;;  %v132_v19 = vand.u32 4294901760, %v1675_v13  ;;  %v458_v2 = vand.u32 31, %v457_v61  ;;  %vm1041_vm15 = vcmask 1040384   ;;  %s1616_s10 = smov 16  }
  0x11   :  { %v104_v20 = vsub.f32 %v81_v10, %v1681_v15  ;;  %v138_v21 = vand.u32 4294901760, %v1679_v14  ;;  %198 = vmatpush.msra.mxu3 %v1656_v4  ;;  %v144_v22 = vand.u32 4294901760, %v1684_v16  ;;  %v1697_v23 = vsub.f32 %v269_v11, %v1686_v17 }
  0x12   :  { %170 = vmatpush.msra.mxu2 %v1675_v13  ;;  %v127_v24 = vsub.f32 %v1671_v12, %v126_v18  ;;  %100 = vmatpush.msra.mxu0 %v1658_v5  ;;  %v133_v25 = vsub.f32 %v1675_v13, %v132_v19  ;;  %vm1742_vm2 = vcmp.lt.s32.totalorder %v458_v2, 16 }
  0x13   :  { %v139_v26 = vsub.f32 %v1679_v14, %v138_v21  ;;  %v105_v27 = vand.u32 4294901760, %v104_v20  ;;  %200 = vmatpush.msra.mxu3 %v1658_v5  ;;  %v145_v28 = vsub.f32 %v1684_v16, %v144_v22  ;;  %v293_v32 = vand.u32 4294901760, %v1697_v23 }
  0x14   :  { %v128_v29 = vand.u32 4294901760, %v127_v24  ;;  %173 = vmatpush.msra.mxu2 %v1679_v14  ;;  %v134_v30 = vand.u32 4294901760, %v133_v25  ;;  %102 = vmatpush.msra.mxu0 %v1666_v9 }
  0x15   :  { %v106_v31 = vsub.f32 %v104_v20, %v105_v27  ;;  %202 = vmatpush.msra.mxu3 %v1666_v9  ;;  %v140_v33 = vand.u32 4294901760, %v139_v26  ;;  %v146_v35 = vand.u32 4294901760, %v145_v28  ;;  %v294_v36 = vsub.f32 %v1697_v23, %v293_v32 }
  0x16   :  { %225 = vmatpush.msrb.mxu0 %v126_v18  ;;  %129 = vmatpush.msra.mxu1 %v128_v29 }
  0x17   :  { %176 = vmatpush.msra.mxu2 %v1684_v16  ;;  %v107_v34 = vand.u32 4294901760, %v106_v31  ;;  %206 = vmatmul.f32.vlgmr.msra.gmra.mxu3 %v105_v27  ;;  %v295_v37 = vand.u32 4294901760, %v294_v36 }
  0x18   :  { %179 = vmatmul.f32.vlgmr.msra.gmra.mxu2 %v104_v20  ;;  %135 = vmatpush.msra.mxu1 %v134_v30 }
  0x19   :  { %284 = vmatpush.msrb.mxu2 %v1654_v3  ;;  %108 = vmatmul.f32.vlgmr.msra.gmra.mxu0 %v107_v34 }
  0x1a   :  { %317 = vmatpush.msrb.mxu3 %v128_v29  ;;  %141 = vmatpush.msra.mxu1 %v140_v33 }
  0x1b   :  { %286 = vmatpush.msrb.mxu2 %v1656_v4  ;;  %229 = vmatpush.msrb.mxu0 %v132_v19 }
  0x1c   :  { %323 = vmatpush.msrb.mxu3 %v134_v30  ;;  %147 = vmatpush.msra.mxu1 %v146_v35 }
  0x1d   :  { %288 = vmatpush.msrb.mxu2 %v1658_v5  ;;  %149 = vmatmul.f32.vlgmr.msra.gmra.mxu1 %v1681_v15 }
  0x1e   :  { %233 = vmatpush.msrb.mxu0 %v138_v21  ;;  %256 = vmatpush.msrb.mxu1 %v1654_v3 }
  0x1f   :  { %290 = vmatpush.msrb.mxu2 %v1666_v9  ;;  %329 = vmatpush.msrb.mxu3 %v140_v33 }
  0x20   :  { %237 = vmatpush.msrb.mxu0 %v144_v22  ;;  %258 = vmatpush.msrb.mxu1 %v1656_v4 }
  0x21   :  { %296 = vmatmul.f32.vlgmr.msrb.gmra.mxu2 %v295_v37  ;;  %335 = vmatpush.msrb.mxu3 %v146_v35 }
  0x22   :  { %413 = vmatpush.msra.mxu2 %v126_v18  ;;  %260 = vmatpush.msrb.mxu1 %v1658_v5 }
  0x23   :  { %239 = vmatmul.f32.vlgmr.msrb.gmra.mxu0 %v1681_v15  ;;  %337 = vmatmul.f32.vlgmr.msrb.gmra.mxu3 %v1686_v17 }
  0x24   :  { %355 = vmatpush.msra.mxu0 %v1671_v12  ;;  %262 = vmatpush.msrb.mxu1 %v1666_v9 }
  0x25   :  { %417 = vmatpush.msra.mxu2 %v132_v19  ;;  %444 = vmatpush.msra.mxu3 %v1654_v3 }
  0x26   :  { %264 = vmatmul.f32.vlgmr.msrb.gmra.mxu1 %v1681_v15  ;;  %358 = vmatpush.msra.mxu0 %v1675_v13 }
  0x27   :  { %384 = vmatpush.msra.mxu1 %v1654_v3  ;;  %421 = vmatpush.msra.mxu2 %v138_v21 }
  0x28   :  { %446 = vmatpush.msra.mxu3 %v1656_v4  ;;  %361 = vmatpush.msra.mxu0 %v1679_v14 }
  0x29   :  { %386 = vmatpush.msra.mxu1 %v1656_v4  ;;  %425 = vmatpush.msra.mxu2 %v144_v22 }
  0x2a   :  { %448 = vmatpush.msra.mxu3 %v1658_v5  ;;  %364 = vmatpush.msra.mxu0 %v1684_v16 }
  0x2b   :  { %388 = vmatpush.msra.mxu1 %v1658_v5  ;;  %427 = vmatmul.f32.vlgmr.msra.gmra.mxu2 %v1686_v17 }
  0x2c   :  { %450 = vmatpush.msra.mxu3 %v1666_v9  ;;  %367 = vmatmul.f32.vlgmr.msra.gmra.mxu0 %v1697_v23 }
  0x2d   :  { %390 = vmatpush.msra.mxu1 %v1666_v9  ;;  %452 = vmatmul.f32.vlgmr.msra.gmra.mxu3 %v1686_v17 }
  0x2e   :  { %394 = vmatmul.f32.vlgmr.msra.gmra.mxu1 %v293_v32  ;;  %516 = vmatpush.msrb.mxu0 %v57_v38 }
  0x2f   :  { %579 = vmatpush.msrb.mxu1 %v57_v38  ;;  %642 = vmatpush.msrb.mxu2 %v57_v38 }
  0x30   :  { %705 = vmatpush.msrb.mxu3 %v57_v38  ;;  %517 = vmatpush.msrb.mxu0 %v56_v39 }
  0x31   :  { %580 = vmatpush.msrb.mxu1 %v56_v39  ;;  %643 = vmatpush.msrb.mxu2 %v56_v39 }
  0x32   :  { %706 = vmatpush.msrb.mxu3 %v56_v39  ;;  %518 = vmatpush.msrb.mxu0 %v55_v40 }
  0x33   :  { %581 = vmatpush.msrb.mxu1 %v55_v40  ;;  %644 = vmatpush.msrb.mxu2 %v55_v40 }
  0x34   :  { %707 = vmatpush.msrb.mxu3 %v55_v40  ;;  %519 = vmatpush.msrb.mxu0 %v54_v41 }
  0x35   :  { %582 = vmatpush.msrb.mxu1 %v54_v41  ;;  %520 = vmatmul.f32.vlgmr.msrb.gmra.mxu0 %v1613_v42 }
  0x36   :  { %645 = vmatpush.msrb.mxu2 %v54_v41  ;;  %708 = vmatpush.msrb.mxu3 %v54_v41 }
  0x37   :  { %768 = vmatpush.msra.mxu0 %v57_v38  ;;  %831 = vmatpush.msra.mxu1 %v57_v38 }
  0x38   :  { %894 = vmatpush.msra.mxu2 %v57_v38  ;;  %957 = vmatpush.msra.mxu3 %v57_v38 }
  0x39   :  { %769 = vmatpush.msra.mxu0 %v56_v39  ;;  %832 = vmatpush.msra.mxu1 %v56_v39 }
  0x3a   :  { %895 = vmatpush.msra.mxu2 %v56_v39  ;;  %958 = vmatpush.msra.mxu3 %v56_v39 }
  0x3b   :  { %770 = vmatpush.msra.mxu0 %v55_v40  ;;  %833 = vmatpush.msra.mxu1 %v55_v40 }
  0x3c   :  { %896 = vmatpush.msra.mxu2 %v55_v40  ;;  %959 = vmatpush.msra.mxu3 %v55_v40 }
  0x3d   :  { %771 = vmatpush.msra.mxu0 %v54_v41  ;;  %834 = vmatpush.msra.mxu1 %v54_v41 }
  0x3e   :  { %897 = vmatpush.msra.mxu2 %v54_v41  ;;  %960 = vmatpush.msra.mxu3 %v54_v41 }
  0x96   :  { %v109_v44 = vpop.f32.mrf.mxu0 }
  0x97   :  { %v110_v45 = vadd.f32 %v1470_v43, %v109_v44 }
  0x9a   :  { %v150_v46 = vpop.f32.mrf.mxu1  ;;  %v207_v48 = vpop.f32.mrf.mxu3 }
  0x9b   :  { %v180_v47 = vpop.f32.mrf.mxu2  ;;  %v151_v49 = vadd.f32 %v150_v46, %v110_v45 }
  0x9d   :  { %v181_v51 = vadd.f32 %v180_v47, %v151_v49 }
  0x9f   :  { %v208_v55 = vadd.f32 %v207_v48, %v181_v51 }
  0xa0   :  { %v240_v50 = vpop.f32.mrf.mxu0 }
  0xa1   :  { %v241_v59 = vadd.f32 %v240_v50, %v208_v55 }
  0xa3   :  { %v265_v52 = vpop.f32.mrf.mxu1 }
  0xa4   :  { %v297_v53 = vpop.f32.mrf.mxu2  ;;  %v266_v1 = vadd.f32 %v265_v52, %v241_v59 }
  0xa5   :  { %v298_v54 = vadd.f32 %v1470_v43, %v297_v53 }
  0xa6   :  { %v338_v57 = vpop.f32.mrf.mxu3  ;;  %v466_v8 = vrot.slane %v266_v1, 7  ;;  %v471_v9 = vrot.slane %v266_v1, 1  ;;  %v474_v10 = vrot.slane %v266_v1, 6  ;;  %v479_v11 = vrot.slane %v266_v1, 2 }
  0xa7   :  { %v339_v58 = vadd.f32 %v338_v57, %v298_v54  ;;  %v483_v12 = vrot.slane %v266_v1, 5  ;;  %v488_v13 = vrot.slane %v266_v1, 3  ;;  %v492_v26 = vrot.slane %v266_v1, 4 }
  0xa9   :  { %v368_v60 = vpop.f32.mrf.mxu0 }
  0xaa   :  { %v369_v62 = vadd.f32 %v368_v60, %v339_v58 }
  0xab   :  { %v395_v63 = vpop.f32.mrf.mxu1 }
  0xac   :  { %v396_v0 = vadd.f32 %v395_v63, %v369_v62 }
  0xae   :  { %v428_v3 = vpop.f32.mrf.mxu2 }
  0xaf   :  { %v429_v4 = vadd.f32 %v428_v3, %v396_v0 }
  0xb0   :  { %v453_v5 = vpop.f32.mrf.mxu3 }
  0xb1   :  { %v454_v6 = vadd.f32 %v453_v5, %v429_v4 }
  0xb2   :  { %v521_v18 = vpop.f32.mrf.mxu0 }
  0xb3   :  { %v462_v14 = vrot.slane %v454_v6, 7  ;;  %v467_v15 = vrot.slane %v454_v6, 6  ;;  %v1747_v16 = vsel %vm463_vm1, %v454_v6, %v471_v9  ;;  %v475_v17 = vrot.slane %v454_v6, 5 }
  0xb4   :  { %v480_v19 = vrot.slane %v454_v6, 1  ;;  %v484_v20 = vrot.slane %v454_v6, 4  ;;  %v489_v21 = vrot.slane %v454_v6, 2  ;;  %v493_v22 = vrot.slane %v454_v6, 3 }
  0xb5   :  { %v1750_v23 = vsel %vm463_vm1, %v462_v14, %v266_v1  ;;  %v1753_v24 = vsel %vm463_vm1, %v467_v15, %v466_v8  ;;  %v1756_v25 = vsel %vm463_vm1, %v475_v17, %v474_v10 }
  0xb6   :  { %v470_v27 = vsel %vm1742_vm2, %v1750_v23, %v1753_v24  ;;  %v478_v28 = vsel %vm1742_vm2, %v1747_v16, %v1756_v25  ;;  %v1767_v29 = vsel %vm463_vm1, %v480_v19, %v479_v11  ;;  %v1770_v30 = vsel %vm463_vm1, %v484_v20, %v483_v12 }
  0xb7   :  { %v524_v31 = vadd.f32 %v521_v18, %v470_v27  ;;  %v487_v32 = vsel %vm1742_vm2, %v1767_v29, %v1770_v30  ;;  %v1777_v33 = vsel %vm463_vm1, %v489_v21, %v488_v13  ;;  %v1780_v34 = vsel %vm463_vm1, %v493_v22, %v492_v26 }
  0xb8   :  { %v496_v35 = vsel %vm1742_vm2, %v1777_v33, %v1780_v34  ;;  %v497_v36 = vsel %vm1742_vm2, %v1780_v34, %v1777_v33  ;;  %v498_v37 = vsel %vm1742_vm2, %v1770_v30, %v1767_v29  ;;  %v499_v38 = vsel %vm1742_vm2, %v1756_v25, %v1747_v16 }
  0xb9   :  { %1473 = vtanh.f32 %v524_v31  ;;  %v500_v39 = vsel %vm1742_vm2, %v1753_v24, %v1750_v23  ;;  %v1435_v41 = vmul.f32 -1.442695, %v524_v31 }
  0xbb   :  { %1475 = vpow2.f32 %v1435_v41 }
  0xbf   :  { %v1474_v40 = vpop.eup %1473 }
  0xc0   :  { %547 = vrot.lane.b32.xlu0 %v1474_v40, %s1614_s8 }
  0xc1   :  { %v1476_v42 = vpop.eup %1475 }
  0xc2   :  { %v528_v43 = vadd.f32 1.0, %v1476_v42 }
  0xc4   :  { %1477 = vrcp.f32 %v528_v43  ;;  %v540_v49 = vand.u32 2147483648, %v528_v43  ;;  %vm534_vm4 = vweird.f32 %v528_v43  ;;  %v538_v50 = vand.u32 2147483647, %v528_v43 }
  0xc6   :  { %v541_v52 = vor.u32 1.1754944e-38, %v540_v49  ;;  %vm539_vm6 = vcmp.eq.f32.partialorder %v538_v50, 8.507059e+37 }
  0xca   :  { %v1478_v44 = vpop.eup %1477 }
  0xcb   :  { %v530_v45 = vmul.f32 %v1478_v44, %v528_v43  ;;  %vm535_vm3 = vweird.f32 %v1478_v44 }
  0xcc   :  { %vm536_vm5 = vmor %vm534_vm4, %vm535_vm3  ;;  %vm1044_vm3 = vcmask 1041408  }
  0xcd   :  { %v531_v46 = vsub.f32 1.0, %v530_v45 }
  0xcf   :  { %v532_v47 = vmul.f32 %v1478_v44, %v531_v46 }
  0xd1   :  { %v533_v48 = vadd.f32 %v1478_v44, %v532_v47 }
  0xd3   :  { %v537_v51 = vsel %vm536_vm5, %v1478_v44, %v533_v48 }
  0xd4   :  { %v542_v54 = vsel %vm539_vm6, %v541_v52, %v537_v51 }
  0xd5   :  { %v545_v56 = vmul.f32 0.0, %v542_v54 }
 0x132   :  { %v548_v53 = vpop.permute.xlu0 %547 }
 0x133   :  { %v550_v55 = vmul.f32 %v548_v53, %v542_v54 }
 0x135   :  { %552 = vrot.lane.b32.xlu0 %v550_v55, %s1615_s9 }
 0x1a7   :  { %v553_v57 = vpop.permute.xlu0 %552 }
 0x1a8   :  { %v555_v58 = vadd.f32 %v553_v57, %v545_v56 }
 0x1aa   :  { %1479 = vtanh.f32 %v555_v58 }
 0x1b0   :  { %v1480_v59 = vpop.eup %1479 }
 0x1b1   :  { %558 = vrot.lane.b32.xlu1 %v1480_v59, %s1614_s8 }
 0x223   :  { %v559_v60 = vpop.permute.xlu1 %558 }
 0x224   :  { %v1805_v61 = vmul.f32 %v559_v60, %v542_v54 }
 0x226   :  { %563 = vrot.lane.b32.xlu1 %v1805_v61, %s1615_s9 }
 0x298   :  { %v564_v62 = vpop.permute.xlu1 %563 }
 0x299   :  { %1436 = vmatmul.msk.f32.vlgmr.msrb.gmra.mxu1 %vm79_vm0, %v564_v62 }
 0x316   :  { %v584_v63 = vpop.f32.mrf.mxu1 }
 0x317   :  { %v587_v0 = vadd.f32 %v584_v63, %v478_v28 }
 0x319   :  { %1481 = vtanh.f32 %v587_v0  ;;  %v1437_v2 = vmul.f32 -1.442695, %v587_v0 }
 0x31b   :  { %1483 = vpow2.f32 %v1437_v2 }
 0x31f   :  { %v1482_v1 = vpop.eup %1481 }
 0x320   :  { %610 = vrot.lane.b32.xlu2 %v1482_v1, %s1614_s8 }
 0x321   :  { %v1484_v3 = vpop.eup %1483 }
 0x322   :  { %v591_v4 = vadd.f32 1.0, %v1484_v3 }
 0x324   :  { %1485 = vrcp.f32 %v591_v4  ;;  %v603_v11 = vand.u32 2147483648, %v591_v4  ;;  %vm597_vm8 = vweird.f32 %v591_v4  ;;  %v601_v12 = vand.u32 2147483647, %v591_v4 }
 0x326   :  { %v604_v14 = vor.u32 1.1754944e-38, %v603_v11  ;;  %vm602_vm10 = vcmp.eq.f32.partialorder %v601_v12, 8.507059e+37 }
 0x32a   :  { %v1486_v5 = vpop.eup %1485 }
 0x32b   :  { %v593_v6 = vmul.f32 %v1486_v5, %v591_v4  ;;  %vm598_vm7 = vweird.f32 %v1486_v5  ;;  %v1003_v4 = vrot.slane %v1805_v61, 1 }
 0x32c   :  { %vm599_vm9 = vmor %vm597_vm8, %vm598_vm7  ;;  %vm1047_vm8 = vcmask 1042432  }
 0x32d   :  { %v594_v8 = vsub.f32 1.0, %v593_v6 }
 0x32f   :  { %v595_v9 = vmul.f32 %v1486_v5, %v594_v8 }
 0x331   :  { %v596_v10 = vadd.f32 %v1486_v5, %v595_v9 }
 0x333   :  { %v600_v13 = vsel %vm599_vm9, %v1486_v5, %v596_v10 }
 0x334   :  { %v605_v17 = vsel %vm602_vm10, %v604_v14, %v600_v13 }
 0x335   :  { %v608_v19 = vmul.f32 %v605_v17, %v555_v58 }
 0x37a   :  { %v611_v15 = vpop.permute.xlu2 %610 }
 0x37b   :  { %v613_v18 = vmul.f32 %v611_v15, %v605_v17 }
 0x37d   :  { %615 = vrot.lane.b32.xlu2 %v613_v18, %s1615_s9 }
 0x3d7   :  { %v616_v20 = vpop.permute.xlu2 %615 }
 0x3d8   :  { %v618_v21 = vadd.f32 %v616_v20, %v608_v19 }
 0x3da   :  { %1487 = vtanh.f32 %v618_v21 }
 0x3e0   :  { %v1488_v22 = vpop.eup %1487 }
 0x3e1   :  { %621 = vrot.lane.b32.xlu0 %v1488_v22, %s1614_s8 }
 0x453   :  { %v622_v26 = vpop.permute.xlu0 %621 }
 0x454   :  { %v1813_v27 = vmul.f32 %v622_v26, %v605_v17 }
 0x456   :  { %626 = vrot.lane.b32.xlu1 %v1813_v27, %s1615_s9  ;;  %v1005_v60 = vrot.slane %v1813_v27, 1  ;;  %v1013_v62 = vperm.slane %v1813_v27, 0  ;;  %v61_v27 = vld [vmem:[#allocation4 + $0x58] sm:$0xff] }
 0x457   :  { %1126 = vmatpush.msrb.mxu1 %v61_v27  ;;  %1101 = vmatpush.msrb.mxu0 %v61_v27 }
 0x458   :  { %v1830_v1 = vperm.slane %v1005_v60, 0  ;;  %v1042_v5 = vsel %vm1041_vm15, %v1805_v61, %v1013_v62 }
 0x45a   :  { %v1043_v9 = vsel %vm1041_vm15, %v1003_v4, %v1830_v1 }
 0x4c8   :  { %v627_v28 = vpop.permute.xlu1 %626 }
 0x4c9   :  { %1438 = vmatmul.msk.f32.vlgmr.msrb.gmra.mxu2 %vm79_vm0, %v627_v28 }
 0x54c   :  { %v647_v31 = vpop.f32.mrf.mxu2 }
 0x54d   :  { %v650_v40 = vadd.f32 %v647_v31, %v487_v32 }
 0x54f   :  { %1489 = vtanh.f32 %v650_v40  ;;  %v1439_v42 = vmul.f32 -1.442695, %v650_v40 }
 0x551   :  { %1491 = vpow2.f32 %v1439_v42 }
 0x555   :  { %v1490_v41 = vpop.eup %1489 }
 0x556   :  { %673 = vrot.lane.b32.xlu2 %v1490_v41, %s1614_s8 }
 0x557   :  { %v1492_v43 = vpop.eup %1491 }
 0x558   :  { %v654_v44 = vadd.f32 1.0, %v1492_v43 }
 0x55a   :  { %1493 = vrcp.f32 %v654_v44  ;;  %v666_v50 = vand.u32 2147483648, %v654_v44  ;;  %vm660_vm12 = vweird.f32 %v654_v44  ;;  %v664_v51 = vand.u32 2147483647, %v654_v44 }
 0x55c   :  { %v667_v52 = vor.u32 1.1754944e-38, %v666_v50  ;;  %vm665_vm14 = vcmp.eq.f32.partialorder %v664_v51, 8.507059e+37 }
 0x560   :  { %v1494_v45 = vpop.eup %1493 }
 0x561   :  { %v656_v46 = vmul.f32 %v1494_v45, %v654_v44  ;;  %vm661_vm11 = vweird.f32 %v1494_v45 }
 0x562   :  { %vm662_vm13 = vmor %vm660_vm12, %vm661_vm11 }
 0x563   :  { %v657_v47 = vsub.f32 1.0, %v656_v46 }
 0x565   :  { %v658_v48 = vmul.f32 %v1494_v45, %v657_v47 }
 0x567   :  { %v659_v49 = vadd.f32 %v1494_v45, %v658_v48 }
 0x569   :  { %v663_v32 = vsel %vm662_vm13, %v1494_v45, %v659_v49  ;;  %vm1050_vm13 = vcmask 1043456  }
 0x56a   :  { %v668_v54 = vsel %vm665_vm14, %v667_v52, %v663_v32 }
 0x56b   :  { %v671_v56 = vmul.f32 %v668_v54, %v618_v21 }
 0x5b0   :  { %v674_v53 = vpop.permute.xlu2 %673 }
 0x5b1   :  { %v676_v55 = vmul.f32 %v674_v53, %v668_v54 }
 0x5b3   :  { %678 = vrot.lane.b32.xlu0 %v676_v55, %s1615_s9 }
 0x625   :  { %v679_v57 = vpop.permute.xlu0 %678 }
 0x626   :  { %v681_v58 = vadd.f32 %v679_v57, %v671_v56 }
 0x628   :  { %1495 = vtanh.f32 %v681_v58 }
 0x62e   :  { %v1496_v59 = vpop.eup %1495 }
 0x62f   :  { %684 = vrot.lane.b32.xlu1 %v1496_v59, %s1614_s8 }
 0x6a1   :  { %v685_v63 = vpop.permute.xlu1 %684 }
 0x6a2   :  { %v1828_v0 = vmul.f32 %v685_v63, %v668_v54 }
 0x6a4   :  { %v1006_v2 = vrot.slane %v1828_v0, 1  ;;  %v1017_v3 = vperm.slane %v1828_v0, 0  ;;  %689 = vrot.lane.b32.xlu2 %v1828_v0, %s1615_s9 }
 0x6a6   :  { %v1841_v6 = vperm.slane %v1006_v2, 0  ;;  %v1045_v8 = vsel %vm1044_vm3, %v1042_v5, %v1017_v3 }
 0x6a8   :  { %v1046_v10 = vsel %vm1044_vm3, %v1043_v9, %v1841_v6 }
 0x6fe   :  { %v690_v11 = vpop.permute.xlu2 %689 }
 0x6ff   :  { %1440 = vmatmul.msk.f32.vlgmr.msrb.gmra.mxu3 %vm79_vm0, %v690_v11 }
 0x782   :  { %v710_v12 = vpop.f32.mrf.mxu3 }
 0x783   :  { %v713_v13 = vadd.f32 %v710_v12, %v496_v35 }
 0x785   :  { %1497 = vtanh.f32 %v713_v13  ;;  %v1441_v15 = vmul.f32 -1.442695, %v713_v13 }
 0x787   :  { %1499 = vpow2.f32 %v1441_v15 }
 0x78b   :  { %v1498_v14 = vpop.eup %1497 }
 0x78c   :  { %736 = vrot.lane.b32.xlu0 %v1498_v14, %s1614_s8 }
 0x78d   :  { %v1500_v17 = vpop.eup %1499 }
 0x78e   :  { %v717_v18 = vadd.f32 1.0, %v1500_v17 }
 0x790   :  { %1501 = vrcp.f32 %v717_v18  ;;  %v729_v28 = vand.u32 2147483648, %v717_v18  ;;  %vm723_vm5 = vweird.f32 %v717_v18  ;;  %v727_v31 = vand.u32 2147483647, %v717_v18 }
 0x792   :  { %v730_v40 = vor.u32 1.1754944e-38, %v729_v28  ;;  %vm728_vm7 = vcmp.eq.f32.partialorder %v727_v31, 8.507059e+37 }
 0x796   :  { %v1502_v19 = vpop.eup %1501 }
 0x797   :  { %v719_v20 = vmul.f32 %v1502_v19, %v717_v18  ;;  %vm724_vm4 = vweird.f32 %v1502_v19 }
 0x798   :  { %vm725_vm6 = vmor %vm723_vm5, %vm724_vm4 }
 0x799   :  { %v720_v21 = vsub.f32 1.0, %v719_v20 }
 0x79b   :  { %v721_v22 = vmul.f32 %v1502_v19, %v720_v21 }
 0x79d   :  { %v722_v26 = vadd.f32 %v1502_v19, %v721_v22 }
 0x79f   :  { %v726_v35 = vsel %vm725_vm6, %v1502_v19, %v722_v26 }
 0x7a0   :  { %v731_v42 = vsel %vm728_vm7, %v730_v40, %v726_v35  ;;  %vm1053_vm7 = vcmask 1044480  }
 0x7a1   :  { %v734_v44 = vmul.f32 %v731_v42, %v681_v58 }
 0x7fe   :  { %v737_v41 = vpop.permute.xlu0 %736 }
 0x7ff   :  { %v739_v43 = vmul.f32 %v737_v41, %v731_v42 }
 0x801   :  { %741 = vrot.lane.b32.xlu1 %v739_v43, %s1615_s9 }
 0x873   :  { %v742_v45 = vpop.permute.xlu1 %741 }
 0x874   :  { %v744_v46 = vadd.f32 %v742_v45, %v734_v44 }
 0x876   :  { %1503 = vtanh.f32 %v744_v46 }
 0x87c   :  { %v1504_v47 = vpop.eup %1503 }
 0x87d   :  { %747 = vrot.lane.b32.xlu2 %v1504_v47, %s1614_s8 }
 0x8d7   :  { %v748_v48 = vpop.permute.xlu2 %747 }
 0x8d8   :  { %v1861_v49 = vmul.f32 %v748_v48, %v731_v42 }
 0x8da   :  { %v1007_v50 = vrot.slane %v1861_v49, 1  ;;  %v1021_v51 = vperm.slane %v1861_v49, 0  ;;  %752 = vrot.lane.b32.xlu0 %v1861_v49, %s1615_s9 }
 0x8dc   :  { %v1867_v32 = vperm.slane %v1007_v50, 0  ;;  %v1048_v52 = vsel %vm1047_vm8, %v1045_v8, %v1021_v51 }
 0x8de   :  { %v1049_v53 = vsel %vm1047_vm8, %v1046_v10, %v1867_v32 }
 0x94c   :  { %v753_v54 = vpop.permute.xlu0 %752 }
 0x94d   :  { %1442 = vmatmul.msk.f32.vlgmr.msra.gmra.mxu0 %vm79_vm0, %v753_v54 }
 0x9ca   :  { %v773_v55 = vpop.f32.mrf.mxu0 }
 0x9cb   :  { %v776_v56 = vadd.f32 %v773_v55, %v497_v36 }
 0x9cd   :  { %1505 = vtanh.f32 %v776_v56  ;;  %v1443_v58 = vmul.f32 -1.442695, %v776_v56 }
 0x9cf   :  { %1507 = vpow2.f32 %v1443_v58 }
 0x9d3   :  { %v1506_v57 = vpop.eup %1505 }
 0x9d4   :  { %799 = vrot.lane.b32.xlu1 %v1506_v57, %s1614_s8 }
 0x9d5   :  { %v1508_v59 = vpop.eup %1507 }
 0x9d6   :  { %v780_v60 = vadd.f32 1.0, %v1508_v59 }
 0x9d8   :  { %1509 = vrcp.f32 %v780_v60  ;;  %v792_v10 = vand.u32 2147483648, %v780_v60  ;;  %vm786_vm10 = vweird.f32 %v780_v60  ;;  %v790_v11 = vand.u32 2147483647, %v780_v60 }
 0x9da   :  { %v793_v34 = vor.u32 1.1754944e-38, %v792_v10  ;;  %vm791_vm12 = vcmp.eq.f32.partialorder %v790_v11, 8.507059e+37 }
 0x9de   :  { %v1510_v63 = vpop.eup %1509 }
 0x9df   :  { %v782_v2 = vmul.f32 %v1510_v63, %v780_v60  ;;  %vm787_vm9 = vweird.f32 %v1510_v63 }
 0x9e0   :  { %vm788_vm11 = vmor %vm786_vm10, %vm787_vm9 }
 0x9e1   :  { %v783_v5 = vsub.f32 1.0, %v782_v2 }
 0x9e3   :  { %v784_v8 = vmul.f32 %v1510_v63, %v783_v5 }
 0x9e5   :  { %v785_v9 = vadd.f32 %v1510_v63, %v784_v8 }
 0x9e7   :  { %v789_v33 = vsel %vm788_vm11, %v1510_v63, %v785_v9 }
 0x9e8   :  { %v794_v12 = vsel %vm791_vm12, %v793_v34, %v789_v33 }
 0x9e9   :  { %v797_v14 = vmul.f32 %v794_v12, %v744_v46 }
 0xa46   :  { %v800_v36 = vpop.permute.xlu1 %799 }
 0xa47   :  { %v802_v13 = vmul.f32 %v800_v36, %v794_v12 }
 0xa49   :  { %804 = vrot.lane.b32.xlu2 %v802_v13, %s1615_s9 }
 0xaa3   :  { %v805_v15 = vpop.permute.xlu2 %804 }
 0xaa4   :  { %v807_v17 = vadd.f32 %v805_v15, %v797_v14 }
 0xaa6   :  { %1511 = vtanh.f32 %v807_v17 }
 0xaac   :  { %v1512_v18 = vpop.eup %1511 }
 0xaad   :  { %810 = vrot.lane.b32.xlu0 %v1512_v18, %s1614_s8 }
 0xb1f   :  { %v811_v19 = vpop.permute.xlu0 %810 }
 0xb20   :  { %v1883_v20 = vmul.f32 %v811_v19, %v794_v12 }
 0xb22   :  { %v1008_v21 = vrot.slane %v1883_v20, 1  ;;  %v1025_v22 = vperm.slane %v1883_v20, 0  ;;  %815 = vrot.lane.b32.xlu1 %v1883_v20, %s1615_s9 }
 0xb24   :  { %v1889_v26 = vperm.slane %v1008_v21, 0  ;;  %v1051_v28 = vsel %vm1050_vm13, %v1048_v52, %v1025_v22 }
 0xb26   :  { %v1052_v31 = vsel %vm1050_vm13, %v1049_v53, %v1889_v26 }
 0xb94   :  { %v816_v35 = vpop.permute.xlu1 %815 }
 0xb95   :  { %1444 = vmatmul.msk.f32.vlgmr.msra.gmra.mxu1 %vm79_vm0, %v816_v35 }
 0xc12   :  { %v836_v40 = vpop.f32.mrf.mxu1 }
 0xc13   :  { %v839_v41 = vadd.f32 %v836_v40, %v498_v37 }
 0xc15   :  { %1513 = vtanh.f32 %v839_v41  ;;  %v1445_v43 = vmul.f32 -1.442695, %v839_v41 }
 0xc17   :  { %1515 = vpow2.f32 %v1445_v43 }
 0xc1b   :  { %v1514_v42 = vpop.eup %1513 }
 0xc1c   :  { %862 = vrot.lane.b32.xlu2 %v1514_v42, %s1614_s8 }
 0xc1d   :  { %v1516_v44 = vpop.eup %1515 }
 0xc1e   :  { %v843_v45 = vadd.f32 1.0, %v1516_v44 }
 0xc20   :  { %1517 = vrcp.f32 %v843_v45  ;;  %v855_v53 = vand.u32 2147483648, %v843_v45  ;;  %vm849_vm4 = vweird.f32 %v843_v45  ;;  %v853_v54 = vand.u32 2147483647, %v843_v45 }
 0xc22   :  { %v856_v30 = vor.u32 1.1754944e-38, %v855_v53  ;;  %vm854_vm6 = vcmp.eq.f32.partialorder %v853_v54, 8.507059e+37 }
 0xc26   :  { %v1518_v46 = vpop.eup %1517 }
 0xc27   :  { %v845_v47 = vmul.f32 %v1518_v46, %v843_v45  ;;  %vm850_vm14 = vweird.f32 %v1518_v46 }
 0xc28   :  { %vm851_vm5 = vmor %vm849_vm4, %vm850_vm14  ;;  %vm1056_vm14 = vcmask 1045504  }
 0xc29   :  { %v846_v48 = vsub.f32 1.0, %v845_v47 }
 0xc2b   :  { %v847_v50 = vmul.f32 %v1518_v46, %v846_v48 }
 0xc2d   :  { %v848_v52 = vadd.f32 %v1518_v46, %v847_v50 }
 0xc2f   :  { %v852_v29 = vsel %vm851_vm5, %v1518_v46, %v848_v52 }
 0xc30   :  { %v857_v55 = vsel %vm854_vm6, %v856_v30, %v852_v29 }
 0xc31   :  { %v860_v57 = vmul.f32 %v857_v55, %v807_v17 }
 0xc76   :  { %v863_v37 = vpop.permute.xlu2 %862 }
 0xc77   :  { %v865_v56 = vmul.f32 %v863_v37, %v857_v55 }
 0xc79   :  { %867 = vrot.lane.b32.xlu0 %v865_v56, %s1615_s9 }
 0xceb   :  { %v868_v58 = vpop.permute.xlu0 %867 }
 0xcec   :  { %v870_v59 = vadd.f32 %v868_v58, %v860_v57 }
 0xcee   :  { %1519 = vtanh.f32 %v870_v59 }
 0xcf4   :  { %v1520_v60 = vpop.eup %1519 }
 0xcf5   :  { %873 = vrot.lane.b32.xlu1 %v1520_v60, %s1614_s8 }
 0xd67   :  { %v874_v63 = vpop.permute.xlu1 %873 }
 0xd68   :  { %v1905_v2 = vmul.f32 %v874_v63, %v857_v55 }
 0xd6a   :  { %v1009_v5 = vrot.slane %v1905_v2, 1  ;;  %v1029_v8 = vperm.slane %v1905_v2, 0  ;;  %878 = vrot.lane.b32.xlu2 %v1905_v2, %s1615_s9 }
 0xd6c   :  { %v1911_v9 = vperm.slane %v1009_v5, 0  ;;  %v1054_v10 = vsel %vm1053_vm7, %v1051_v28, %v1029_v8 }
 0xd6e   :  { %v1055_v11 = vsel %vm1053_vm7, %v1052_v31, %v1911_v9 }
 0xdc4   :  { %v879_v33 = vpop.permute.xlu2 %878 }
 0xdc5   :  { %1446 = vmatmul.msk.f32.vlgmr.msra.gmra.mxu2 %vm79_vm0, %v879_v33 }
 0xe48   :  { %v899_v34 = vpop.f32.mrf.mxu2 }
 0xe49   :  { %v902_v36 = vadd.f32 %v899_v34, %v499_v38 }
 0xe4b   :  { %1521 = vtanh.f32 %v902_v36  ;;  %v1447_v13 = vmul.f32 -1.442695, %v902_v36 }
 0xe4d   :  { %1523 = vpow2.f32 %v1447_v13 }
 0xe51   :  { %v1522_v12 = vpop.eup %1521 }
 0xe52   :  { %925 = vrot.lane.b32.xlu0 %v1522_v12, %s1614_s8 }
 0xe53   :  { %v1524_v14 = vpop.eup %1523 }
 0xe54   :  { %v906_v15 = vadd.f32 1.0, %v1524_v14 }
 0xe56   :  { %1525 = vrcp.f32 %v906_v15  ;;  %v918_v31 = vand.u32 2147483648, %v906_v15  ;;  %vm912_vm10 = vweird.f32 %v906_v15  ;;  %v916_v35 = vand.u32 2147483647, %v906_v15 }
 0xe58   :  { %v919_v25 = vor.u32 1.1754944e-38, %v918_v31  ;;  %vm917_vm12 = vcmp.eq.f32.partialorder %v916_v35, 8.507059e+37 }
 0xe5c   :  { %v1526_v17 = vpop.eup %1525 }
 0xe5d   :  { %v908_v18 = vmul.f32 %v1526_v17, %v906_v15  ;;  %vm913_vm9 = vweird.f32 %v1526_v17  ;;  %v59_v15 = vld [vmem:[#allocation4 + $0x48] sm:$0xff] }
 0xe5e   :  { %vm914_vm11 = vmor %vm912_vm10, %vm913_vm9  ;;  %1151 = vmatpush.msrb.mxu2 %v59_v15  ;;  %1176 = vmatpush.msrb.mxu3 %v59_v15  ;;  %vm1059_vm9 = vcmask 1046528   ;;  %v1273_v15 = vld [vmem:[%s2026_s2 + $0x8] sm:$0xff] }
 0xe5f   :  { %v909_v19 = vsub.f32 1.0, %v908_v18 }
 0xe61   :  { %v910_v21 = vmul.f32 %v1526_v17, %v909_v19 }
 0xe63   :  { %v911_v28 = vadd.f32 %v1526_v17, %v910_v21 }
 0xe65   :  { %v915_v16 = vsel %vm914_vm11, %v1526_v17, %v911_v28  ;;  %v58_v17 = vld [vmem:[#allocation4 + $0x40] sm:$0xff] }
 0xe66   :  { %v920_v40 = vsel %vm917_vm12, %v919_v25, %v915_v16  ;;  %1152 = vmatpush.msrb.mxu2 %v58_v17  ;;  %1177 = vmatpush.msrb.mxu3 %v58_v17 }
 0xe67   :  { %v923_v42 = vmul.f32 %v920_v40, %v870_v59 }
 0xec4   :  { %v926_v38 = vpop.permute.xlu0 %925 }
 0xec5   :  { %v928_v41 = vmul.f32 %v926_v38, %v920_v40 }
 0xec7   :  { %930 = vrot.lane.b32.xlu1 %v928_v41, %s1615_s9 }
 0xf39   :  { %v931_v43 = vpop.permute.xlu1 %930 }
 0xf3a   :  { %v933_v44 = vadd.f32 %v931_v43, %v923_v42 }
 0xf3c   :  { %1527 = vtanh.f32 %v933_v44 }
 0xf42   :  { %v1528_v45 = vpop.eup %1527 }
 0xf43   :  { %936 = vrot.lane.b32.xlu2 %v1528_v45, %s1614_s8  ;;  %v67_v45 = vld [vmem:[#allocation4 + $0x88] sm:$0xff] }
 0xf9d   :  { %v937_v46 = vpop.permute.xlu2 %936 }
 0xf9e   :  { %v939_v47 = vmul.f32 %v937_v46, %v920_v40  ;;  %v66_v46 = vld [vmem:[#allocation4 + $0x80] sm:$0xff] }
 0xfa0   :  { %v1010_v48 = vrot.slane %v939_v47, 1  ;;  %v1033_v50 = vperm.slane %v939_v47, 0  ;;  %941 = vrot.lane.b32.xlu0 %v939_v47, %s1615_s9  ;;  %v1975_v47 = vld [vmem:[#allocation2] sm:$0x3] }
 0xfa2   :  { %v1034_v52 = vperm.slane %v1010_v48, 0  ;;  %v1057_v53 = vsel %vm1056_vm14, %v1054_v10, %v1033_v50  ;;  %v65_v48 = vld [vmem:[#allocation4 + $0x78] sm:$0xff] }
 0xfa4   :  { %v1058_v54 = vsel %vm1056_vm14, %v1055_v11, %v1034_v52 }
0x1012   :  { %v942_v29 = vpop.permute.xlu0 %941 }
0x1013   :  { %1448 = vmatmul.msk.f32.vlgmr.msra.gmra.mxu3 %vm79_vm0, %v942_v29 }
0x1096   :  { %v962_v30 = vpop.f32.mrf.mxu3 }
0x1097   :  { %v965_v37 = vadd.f32 %v962_v30, %v500_v39 }
0x1099   :  { %1529 = vtanh.f32 %v965_v37  ;;  %v1449_v56 = vmul.f32 -1.442695, %v965_v37 }
0x109b   :  { %1531 = vpow2.f32 %v1449_v56 }
0x109f   :  { %v1530_v55 = vpop.eup %1529 }
0x10a0   :  { %988 = vrot.lane.b32.xlu1 %v1530_v55, %s1614_s8 }
0x10a1   :  { %v1532_v57 = vpop.eup %1531 }
0x10a2   :  { %v969_v58 = vadd.f32 1.0, %v1532_v57 }
0x10a4   :  { %1533 = vrcp.f32 %v969_v58  ;;  %v981_v7 = vand.u32 2147483648, %v969_v58  ;;  %vm975_vm5 = vweird.f32 %v969_v58  ;;  %v979_v11 = vand.u32 2147483647, %v969_v58 }
0x10a6   :  { %v982_v24 = vor.u32 1.1754944e-38, %v981_v7  ;;  %vm980_vm6 = vcmp.eq.f32.partialorder %v979_v11, 8.507059e+37  ;;  %v1472_v7 = vld [vmem:[%s2028_s4 + $0x2] ss:$0 sm:$0xff] }
0x10aa   :  { %v1534_v59 = vpop.eup %1533 }
0x10ab   :  { %v971_v60 = vmul.f32 %v1534_v59, %v969_v58  ;;  %vm976_vm4 = vweird.f32 %v1534_v59 }
0x10ac   :  { %vm977_vm2 = vmor %vm975_vm5, %vm976_vm4  ;;  %vm1375_vm5 = vcmask 253952  }
0x10ad   :  { %v972_v63 = vsub.f32 1.0, %v971_v60 }
0x10af   :  { %v973_v5 = vmul.f32 %v1534_v59, %v972_v63 }
0x10b1   :  { %v974_v10 = vadd.f32 %v1534_v59, %v973_v5 }
0x10b3   :  { %v978_v23 = vsel %vm977_vm2, %v1534_v59, %v974_v10 }
0x10b4   :  { %v983_v33 = vsel %vm980_vm6, %v982_v24, %v978_v23 }
0x10b5   :  { %v986_v36 = vmul.f32 %v983_v33, %v933_v44  ;;  %v69_v44 = vld [vmem:[#allocation4 + $0x98] sm:$0xff] }
0x10b6   :  { %1250 = vmatpush.msra.mxu2 %v69_v44 }
0x1112   :  { %v989_v39 = vpop.permute.xlu1 %988 }
0x1113   :  { %v991_v34 = vmul.f32 %v989_v39, %v983_v33 }
0x1115   :  { %993 = vrot.lane.b32.xlu2 %v991_v34, %s1615_s9 }
0x116f   :  { %v994_v12 = vpop.permute.xlu2 %993 }
0x1170   :  { %v996_v13 = vadd.f32 %v994_v12, %v986_v36 }
0x1172   :  { %1535 = vtanh.f32 %v996_v13 }
0x1178   :  { %v1536_v14 = vpop.eup %1535 }
0x1179   :  { %999 = vrot.lane.b32.xlu0 %v1536_v14, %s1614_s8 }
0x11eb   :  { %v1000_v18 = vpop.permute.xlu0 %999 }
0x11ec   :  { %v1002_v19 = vmul.f32 %v1000_v18, %v983_v33  ;;  %v1272_v18 = vld [vmem:[%s2026_s2] sm:$0xff] }
0x11ee   :  { %v1012_v21 = vrot.slane %v1002_v19, 1  ;;  %v1037_v28 = vperm.slane %v1002_v19, 0  ;;  %v1067_v31 = vsel %vm1041_vm15, %v1002_v19, %v1033_v50  ;;  %v64_v50 = vld [vmem:[#allocation4 + $0x70] sm:$0xff] }
0x11ef   :  { %v1069_v35 = vsel %vm1044_vm3, %v1067_v31, %v1029_v8 }
0x11f0   :  { %v1068_v16 = vsel %vm1041_vm15, %v1012_v21, %v1034_v52  ;;  %v1071_v25 = vsel %vm1047_vm8, %v1069_v35, %v1025_v22  ;;  %v1060_v38 = vsel %vm1059_vm9, %v1057_v53, %v1037_v28  ;;  %v1038_v40 = vperm.slane %v1012_v21, 0  ;;  %v63_v52 = vld [vmem:[#allocation4 + $0x68] sm:$0xff]  ;;  %v62_v53 = vld [vmem:[#allocation4 + $0x60] sm:$0xff] }
0x11f1   :  { %v1070_v41 = vsel %vm1044_vm3, %v1068_v16, %v1911_v9  ;;  %1133 = vrot.lane.b32.xlu2 %v1060_v38, %s1615_s9  ;;  %v1073_v2 = vsel %vm1050_vm13, %v1071_v25, %v1021_v51  ;;  %v1064_v51 = vperm.slane %v1003_v4, 0  ;;  %vm1084_vm15 = vcmask 130048  }
0x11f2   :  { %v1061_v8 = vsel %vm1059_vm9, %v1058_v54, %v1038_v40  ;;  %v1072_v42 = vsel %vm1047_vm8, %v1070_v41, %v1889_v26  ;;  %v1075_v20 = vsel %vm1053_vm7, %v1073_v2, %v1017_v3  ;;  %v1063_v26 = vperm.slane %v1805_v61, 0  ;;  %v68_v61 = vld [vmem:[#allocation4 + $0x90] sm:$0xff]  ;;  %v1471_v54 = vld [vmem:[%s2028_s4 + $0x1] ss:$0 sm:$0xff] }
0x11f3   :  { %1158 = vrot.lane.b32.xlu1 %v1061_v8, %s1615_s9  ;;  %v1074_v22 = vsel %vm1050_vm13, %v1072_v42, %v1867_v32  ;;  %v1077_v49 = vsel %vm1056_vm14, %v1075_v20, %v1013_v62  ;;  %v60_v62 = vld [vmem:[#allocation4 + $0x50] sm:$0xff]  ;;  %1251 = vmatpush.msra.mxu2 %v68_v61  ;;  %vm1276_vm3 = vcmask 7168   ;;  %v1617_v42 = vmov 0  }
0x11f4   :  { %v1076_v9 = vsel %vm1053_vm7, %v1074_v22, %v1841_v6  ;;  %v1079_v32 = vsel %vm1059_vm9, %v1077_v49, %v1063_v26  ;;  %1127 = vmatpush.msrb.mxu1 %v60_v62  ;;  %1102 = vmatpush.msrb.mxu0 %v60_v62 }
0x11f5   :  { %v1078_v0 = vsel %vm1056_vm14, %v1076_v9, %v1830_v1  ;;  %1252 = vmatpush.msra.mxu2 %v67_v45  ;;  %1468 = vset.pattern.permute.xlu1 %v1617_v42 }
0x11f6   :  { %v1080_v3 = vsel %vm1059_vm9, %v1078_v0, %v1064_v51  ;;  %1226 = vmatpush.msra.mxu1 %v65_v48  ;;  %1203 = vmatpush.msra.mxu0 %v65_v48 }
0x11f7   :  { %1108 = vrot.lane.b32.xlu0 %v1080_v3, %s1616_s10  ;;  %1253 = vmatpush.msra.mxu2 %v66_v46 }
0x11f8   :  { %1227 = vmatpush.msra.mxu1 %v64_v50  ;;  %1204 = vmatpush.msra.mxu0 %v64_v50 }
0x11f9   :  { %1469 = vset.pattern.permute.xlu0 %v1617_v42 }
0x11fa   :  { %1228 = vmatpush.msra.mxu1 %v63_v52  ;;  %1205 = vmatpush.msra.mxu0 %v63_v52 }
0x11fb   :  { %1082 = vrot.lane.b32.xlu1 %v1079_v32, %s1616_s10 }
0x11fc   :  { %1229 = vmatpush.msra.mxu1 %v62_v53  ;;  %1206 = vmatpush.msra.mxu0 %v62_v53 }
0x124b   :  { %v1134_v4 = vpop.permute.xlu2 %1133 }
0x124c   :  { %1452 = vmatmul.msk.f32.vlgmr.msrb.gmra.mxu2 %vm1084_vm15, %v1134_v4 }
0x1254   :  { %1456 = vmatmul.msk.f32.vlgmr.msra.gmra.mxu2 %vm79_vm0, %v1975_v47 }
0x1265   :  { %v1159_v6 = vpop.permute.xlu1 %1158 }
0x1266   :  { %1453 = vmatmul.msk.f32.vlgmr.msrb.gmra.mxu3 %vm1084_vm15, %v1159_v6 }
0x1269   :  { %v1109_v1 = vpop.permute.xlu0 %1108 }
0x126a   :  { %1451 = vmatmul.msk.f32.vlgmr.msrb.gmra.mxu1 %vm1084_vm15, %v1109_v1 }
0x126d   :  { %v1083_v43 = vpop.permute.xlu1 %1082 }
0x126e   :  { %1450 = vmatmul.msk.f32.vlgmr.msrb.gmra.mxu0 %vm1084_vm15, %v1083_v43 }
0x12cf   :  { %v1154_v55 = vpop.f32.mrf.mxu2 }
0x12d7   :  { %v1255_v5 = vpop.f32.mrf.mxu2 }
0x12d8   :  { %v1259_v10 = vrot.slane %v1255_v5, 1  ;;  %v1260_v33 = vperm.slane %v1255_v5, 0 }
0x12da   :  { %v1261_v11 = vperm.slane %v1259_v10, 0 }
0x12e7   :  { %v1129_v29 = vpop.f32.mrf.mxu1 }
0x12e9   :  { %v1179_v30 = vpop.f32.mrf.mxu3 }
0x12ea   :  { %v1180_v37 = vadd.f32 %v1179_v30, %v1129_v29 }
0x12eb   :  { %v1104_v56 = vpop.f32.mrf.mxu0 }
0x12ec   :  { %v1184_v57 = vadd.f32 %v1471_v54, %v1180_v37  ;;  %v1155_v58 = vadd.f32 %v1154_v55, %v1104_v56 }
0x12ee   :  { %1537 = vtanh.f32 %v1184_v57  ;;  %v1183_v59 = vadd.f32 %v1471_v54, %v1155_v58 }
0x12f0   :  { %1539 = vtanh.f32 %v1183_v59 }
0x12f4   :  { %v1538_v60 = vpop.eup %1537 }
0x12f5   :  { %1455 = vmatmul.msk.f32.vlgmr.msra.gmra.mxu1 %vm79_vm0, %v1538_v60 }
0x12f6   :  { %v1540_v63 = vpop.eup %1539 }
0x12f7   :  { %1454 = vmatmul.msk.f32.vlgmr.msra.gmra.mxu0 %vm79_vm0, %v1540_v63 }
0x1372   :  { %v1231_v23 = vpop.f32.mrf.mxu1 }
0x1373   :  { %v1987_v24 = vadd.f32 %v1472_v7, %v1231_v23 }
0x1374   :  { %v1208_v39 = vpop.f32.mrf.mxu0 }
0x1375   :  { %v1989_v34 = vadd.f32 %v1472_v7, %v1208_v39  ;;  %v1265_v36 = vmul.f32 %v1261_v11, %v1987_v24 }
0x1377   :  { %v1269_v12 = vsel %vm79_vm0, %v1265_v36, 0.0  ;;  %v1264_v13 = vmul.f32 %v1260_v33, %v1989_v34 }
0x1378   :  { %1270 = vadd.xlane.f32.xlu2 %v1269_v12 }
0x1379   :  { %v1266_v14 = vsel %vm79_vm0, %v1264_v13, 0.0 }
0x137a   :  { %1267 = vadd.xlane.f32.xlu0 %v1266_v14 }
0x13eb   :  { %v1271_v17 = vpop.xlane.xlu2 %1270 }
0x13ec   :  { %v1275_v19 = vadd.f32 %v1273_v15, %v1271_v17 }
0x13ed   :  { %v1268_v21 = vpop.xlane.xlu0 %1267 }
0x13ee   :  { %v1284_v28 = vsel %vm1276_vm3, %v1275_v19, -inf  ;;  %v1274_v31 = vadd.f32 %v1272_v18, %v1268_v21 }
0x13ef   :  { %v1285_v35 = vrot.slane %v1284_v28, 4 }
0x13f0   :  { %v1277_v16 = vsel %vm1276_vm3, %v1274_v31, -inf }
0x13f1   :  { %v1286_v25 = vmax.f32 %v1284_v28, %v1285_v35  ;;  %v1278_v38 = vrot.slane %v1277_v16, 4 }
0x13f3   :  { %v1287_v40 = vrot.slane %v1286_v25, 2  ;;  %v1279_v41 = vmax.f32 %v1277_v16, %v1278_v38 }
0x13f5   :  { %v1288_v2 = vmax.f32 %v1286_v25, %v1287_v40  ;;  %v1280_v8 = vrot.slane %v1279_v41, 2  ;;  %v1369_v40 = vrot.slane %v1975_v47, 1 }
0x13f7   :  { %v1289_v20 = vrot.slane %v1288_v2, 1  ;;  %v1281_v22 = vmax.f32 %v1279_v41, %v1280_v8 }
0x13f9   :  { %v1290_v49 = vmax.f32 %v1288_v2, %v1289_v20  ;;  %v1282_v51 = vrot.slane %v1281_v22, 1  ;;  %v74_v2 = vld [vmem:[%s2028_s4 + $0x4] sm:$0x1] }
0x13fb   :  { %v1292_v9 = vsub.f32 %v1275_v19, %v1290_v49  ;;  %v1283_v0 = vmax.f32 %v1281_v22, %v1282_v51  ;;  %v1372_v49 = vmul.f32 %v1369_v40, %v74_v2 }
0x13fd   :  { %v1295_v3 = vmul.f32 1.442695, %v1292_v9  ;;  %v1291_v26 = vsub.f32 %v1274_v31, %v1283_v0 }
0x13ff   :  { %1541 = vpow2.f32 %v1295_v3  ;;  %v1293_v32 = vmul.f32 1.442695, %v1291_v26 }
0x1401   :  { %1543 = vpow2.f32 %v1293_v32 }
0x1405   :  { %v1542_v27 = vpop.eup %1541 }
0x1406   :  { %v1304_v62 = vsel %vm1276_vm3, %v1542_v27, 0.0 }
0x1407   :  { %v1544_v4 = vpop.eup %1543  ;;  %v1305_v6 = vrot.slane %v1304_v62, 4 }
0x1408   :  { %v1297_v1 = vsel %vm1276_vm3, %v1544_v4, 0.0 }
0x1409   :  { %v1306_v43 = vadd.f32 %v1305_v6, %v1304_v62  ;;  %v1298_v44 = vrot.slane %v1297_v1, 4 }
0x140b   :  { %v1307_v61 = vrot.slane %v1306_v43, 2  ;;  %v1299_v45 = vadd.f32 %v1298_v44, %v1297_v1  ;;  %v75_v1 = vld [vmem:[%s2028_s4 + $0x5] sm:$0x1] }
0x140d   :  { %v1308_v46 = vadd.f32 %v1307_v61, %v1306_v43  ;;  %v1300_v48 = vrot.slane %v1299_v45, 2 }
0x140f   :  { %v1309_v50 = vrot.slane %v1308_v46, 1  ;;  %v1301_v52 = vadd.f32 %v1300_v48, %v1299_v45 }
0x1411   :  { %v1310_v53 = vadd.f32 %v1309_v50, %v1308_v46  ;;  %v1302_v54 = vrot.slane %v1301_v52, 1 }
0x1413   :  { %1545 = vrcp.f32 %v1310_v53  ;;  %v1303_v29 = vadd.f32 %v1302_v54, %v1301_v52  ;;  %v1337_v58 = vand.u32 2147483648, %v1310_v53  ;;  %v1335_v60 = vand.u32 2147483647, %v1310_v53 }
0x1414   :  { %vm1331_vm13 = vweird.f32 %v1310_v53 }
0x1415   :  { %1547 = vrcp.f32 %v1303_v29  ;;  %v1338_v7 = vor.u32 1.1754944e-38, %v1337_v58  ;;  %vm1336_vm10 = vcmp.eq.f32.partialorder %v1335_v60, 8.507059e+37  ;;  %v1322_v33 = vand.u32 2147483648, %v1303_v29 }
0x1416   :  { %vm1316_vm12 = vweird.f32 %v1303_v29  ;;  %v1320_v12 = vand.u32 2147483647, %v1303_v29 }
0x1417   :  { %v1323_v14 = vor.u32 1.1754944e-38, %v1322_v33 }
0x1418   :  { %vm1321_vm4 = vcmp.eq.f32.partialorder %v1320_v12, 8.507059e+37 }
0x1419   :  { %v1546_v30 = vpop.eup %1545 }
0x141a   :  { %v1327_v37 = vmul.f32 %v1546_v30, %v1310_v53  ;;  %vm1332_vm8 = vweird.f32 %v1546_v30 }
0x141b   :  { %v1548_v55 = vpop.eup %1547  ;;  %vm1333_vm7 = vmor %vm1331_vm13, %vm1332_vm8  ;;  %vm1427_vm13 = vcmask 1024  }
0x141c   :  { %v1328_v56 = vsub.f32 1.0, %v1327_v37  ;;  %v1312_v57 = vmul.f32 %v1548_v55, %v1303_v29  ;;  %vm1317_vm11 = vweird.f32 %v1548_v55 }
0x141d   :  { %vm1318_vm14 = vmor %vm1316_vm12, %vm1317_vm11 }
0x141e   :  { %v1329_v59 = vmul.f32 %v1546_v30, %v1328_v56  ;;  %v1313_v63 = vsub.f32 1.0, %v1312_v57 }
0x1420   :  { %v1330_v5 = vadd.f32 %v1546_v30, %v1329_v59  ;;  %v1314_v10 = vmul.f32 %v1548_v55, %v1313_v63 }
0x1422   :  { %v1334_v11 = vsel %vm1333_vm7, %v1546_v30, %v1330_v5  ;;  %v1315_v23 = vadd.f32 %v1548_v55, %v1314_v10 }
0x1423   :  { %v1339_v39 = vsel %vm1336_vm10, %v1338_v7, %v1334_v11 }
0x1424   :  { %v1340_v36 = vmul.f32 %v1542_v27, %v1339_v39  ;;  %v1319_v13 = vsel %vm1318_vm14, %v1548_v55, %v1315_v23  ;;  %v1371_v27 = vmul.f32 %v1975_v47, %v74_v2 }
0x1425   :  { %v1324_v15 = vsel %vm1321_vm4, %v1323_v14, %v1319_v13 }
0x1426   :  { %1348 = vperm.xlu1 %1468, %v1340_v36   ;;  %v1325_v17 = vmul.f32 %v1544_v4, %v1324_v15 }
0x142e   :  { %1343 = vperm.xlu1 %1468, %v1325_v17  }
0x1498   :  { %v1349_v18 = vpop.permute.xlu1 %1348 }
0x1499   :  { %v1352_v19 = vmul.f32 %v1349_v18, %v1987_v24  ;;  %v73_v24 = vld [vmem:[%s2028_s4 + $0x3] sm:$0x1] }
0x149b   :  { %v1360_v21 = vsel %vm79_vm0, %v1352_v19, 0.0 }
0x149c   :  { %v1361_v28 = vrot.slane %v1360_v21, 4 }
0x149e   :  { %v1362_v31 = vadd.f32 %v1361_v28, %v1360_v21 }
0x14a0   :  { %v1363_v35 = vrot.slane %v1362_v31, 2  ;;  %v1344_v16 = vpop.permute.xlu1 %1343 }
0x14a1   :  { %v1351_v25 = vmul.f32 %v1344_v16, %v1989_v34 }
0x14a2   :  { %v1364_v38 = vadd.f32 %v1363_v35, %v1362_v31 }
0x14a3   :  { %v1353_v41 = vsel %vm79_vm0, %v1351_v25, 0.0 }
0x14a4   :  { %v1365_v8 = vrot.slane %v1364_v38, 1  ;;  %v1354_v42 = vrot.slane %v1353_v41, 4 }
0x14a6   :  { %v1355_v20 = vadd.f32 %v1354_v42, %v1353_v41  ;;  %v1366_v22 = vadd.f32 %v1365_v8, %v1364_v38 }
0x14a8   :  { %v1356_v51 = vrot.slane %v1355_v20, 2  ;;  %v1368_v34 = vmul.f32 %v1366_v22, %v73_v24 }
0x14aa   :  { %v1357_v9 = vadd.f32 %v1356_v51, %v1355_v20  ;;  %v1374_v0 = vadd.f32 %v1372_v49, %v1368_v34 }
0x14ac   :  { %v1358_v3 = vrot.slane %v1357_v9, 1  ;;  %v1379_v26 = vsel %vm1375_vm5, %v1374_v0, 0.0 }
0x14ad   :  { %1380 = vadd.xlane.f32.xlu1 %v1379_v26 }
0x14ae   :  { %v1359_v32 = vadd.f32 %v1358_v3, %v1357_v9 }
0x14b0   :  { %v1367_v62 = vmul.f32 %v1359_v32, %v73_v24 }
0x14b2   :  { %v1373_v4 = vadd.f32 %v1371_v27, %v1367_v62 }
0x14b4   :  { %v1376_v6 = vsel %vm1375_vm5, %v1373_v4, 0.0 }
0x14b5   :  { %1377 = vadd.xlane.f32.xlu2 %v1376_v6 }
0x1520   :  { %v1381_v43 = vpop.xlane.xlu1 %1380 }
0x1521   :  { %v1383_v44 = vadd.f32 %v1381_v43, %v75_v1 }
0x1523   :  { %v1458_v61 = vmul.f32 -1.442695, %v1383_v44 }
0x1525   :  { %1549 = vpow2.f32 %v1458_v61 }
0x1528   :  { %v1378_v45 = vpop.xlane.xlu2 %1377 }
0x1529   :  { %v1382_v46 = vadd.f32 %v1378_v45, %v75_v1 }
0x152b   :  { %v1550_v48 = vpop.eup %1549  ;;  %v1457_v50 = vmul.f32 -1.442695, %v1382_v46 }
0x152c   :  { %v1391_v52 = vadd.f32 1.0, %v1550_v48 }
0x152d   :  { %1551 = vpow2.f32 %v1457_v50 }
0x152e   :  { %1553 = vrcp.f32 %v1391_v52  ;;  %v1418_v57 = vand.u32 2147483648, %v1391_v52  ;;  %vm1412_vm2 = vweird.f32 %v1391_v52  ;;  %v1416_v58 = vand.u32 2147483647, %v1391_v52 }
0x1530   :  { %v1419_v5 = vor.u32 1.1754944e-38, %v1418_v57  ;;  %vm1417_vm9 = vcmp.eq.f32.partialorder %v1416_v58, 8.507059e+37 }
0x1533   :  { %v1552_v47 = vpop.eup %1551 }
0x1534   :  { %v1554_v53 = vpop.eup %1553  ;;  %v1390_v54 = vadd.f32 1.0, %v1552_v47 }
0x1535   :  { %v1408_v29 = vmul.f32 %v1554_v53, %v1391_v52  ;;  %vm1413_vm0 = vweird.f32 %v1554_v53 }
0x1536   :  { %1555 = vrcp.f32 %v1390_v54  ;;  %vm1414_vm6 = vmor %vm1412_vm2, %vm1413_vm0  ;;  %v1403_v10 = vand.u32 2147483648, %v1390_v54  ;;  %v1401_v11 = vand.u32 2147483647, %v1390_v54  ;;  %vm1397_vm3 = vweird.f32 %v1390_v54 }
0x1537   :  { %v1409_v30 = vsub.f32 1.0, %v1408_v29 }
0x1538   :  { %v1404_v33 = vor.u32 1.1754944e-38, %v1403_v10  ;;  %vm1402_vm7 = vcmp.eq.f32.partialorder %v1401_v11, 8.507059e+37 }
0x1539   :  { %v1410_v37 = vmul.f32 %v1554_v53, %v1409_v30 }
0x153b   :  { %v1411_v55 = vadd.f32 %v1554_v53, %v1410_v37 }
0x153c   :  { %v1556_v56 = vpop.eup %1555 }
0x153d   :  { %v1393_v59 = vmul.f32 %v1556_v56, %v1390_v54  ;;  %v1415_v60 = vsel %vm1414_vm6, %v1554_v53, %v1411_v55  ;;  %vm1398_vm15 = vweird.f32 %v1556_v56 }
0x153e   :  { %v1420_v23 = vsel %vm1417_vm9, %v1419_v5, %v1415_v60  ;;  %vm1399_vm8 = vmor %vm1397_vm3, %vm1398_vm15 }
0x153f   :  { %v1394_v63 = vsub.f32 1.0, %v1393_v59  ;;  %v1424_v36 = vrot.slane %v1420_v23, 7 }
0x1541   :  { %v1395_v7 = vmul.f32 %v1556_v56, %v1394_v63 }
0x1543   :  { %v1396_v39 = vadd.f32 %v1556_v56, %v1395_v7 }
0x1545   :  { %v1400_v12 = vsel %vm1399_vm8, %v1556_v56, %v1396_v39 }
0x1546   :  { %v1405_v13 = vsel %vm1402_vm7, %v1404_v33, %v1400_v12 }
0x1547   :  { %v1425_v14 = vsel %vm463_vm1, %v1424_v36, %v1405_v13 }
0x1548   :  { %1428 = vst.msk [vmem:[%s2029_s5] sm:$0x3] %vm1427_vm13, %v1425_v14 }
0x1549   :  { %1433 = vsyncpa [#allocation3], 1 }
0x154a   :  { %1434 = vsyncpa [#allocation5], 1 }

</bundles_post_ra>
